<compile_context>
chip_gen: v7x
topology: tpu7x:2x2x1
jax: 0.10.0
libtpu: 0.0.40
codegen_flags: <defaults>
</compile_context>

<pallas_src>
import functools

import jax
import jax.numpy as jnp
from jax.experimental import pallas as pl
from jax.experimental.pallas import tpu as pltpu


def session_gru_kernel(x_ref, his_len_ref, cur_len_ref,
                       wih_ref, bi_ref, whh_h_ref, whh_c_ref,
                       out_ref, hc_ref, *, Th, Tc):
    B, H = hc_ref.shape                    # B is sublane-padded (multiple of 8)
    GW = whh_h_ref.shape[1]                # fused gate width (lane-padded >= 3H)

    his_len = his_len_ref[...]             # [B, 1] int32
    cur_len = cur_len_ref[...]             # [B, 1] int32

    # Hoisted loads / constants (JAX does not CSE these inside unrolled bodies).
    whh_h = whh_h_ref[...]                 # [H+1, GW]  (row H carries b_hh_n)
    whh_c = whh_c_ref[...]                 # [H+1, GW]
    ones_col = jnp.ones((B, 1), jnp.float32)

    # Hoisted input-path gate pre-activations: ONE block-diagonal matmul for
    # both RNNs ([Tmax*B, 2D] x [2D, 2GW] -> [gi_his | gi_cur]).  b_ih (all
    # gates) and b_hh (r, z) are pre-folded into bi.
    gi_all = jnp.dot(x_ref[...], wih_ref[...],
                     preferred_element_type=jnp.float32) + bi_ref[...]
    gi_his = gi_all[:, :GW]
    gi_cur = gi_all[:, GW:]

    # Freeze masks hoisted off the recurrence (one tiny compare per step).
    his_valid = [t < his_len for t in range(Th)]
    cur_valid = [t < cur_len for t in range(Tc)]

    def gru_step(h, gi_t, whh):
        # Only the h-dependent half of the GRU stays on the serial chain:
        # one [B, H+1] x [H+1, GW] MXU push (the extra contraction row folds
        # b_hh_n in), one wide sigmoid over the r|z lanes, one tanh.
        h_aug = jnp.concatenate([h, ones_col], axis=1)                 # [B, H+1]
        gh = jnp.dot(h_aug, whh, preferred_element_type=jnp.float32)  # [B, GW]
        rz = jax.nn.sigmoid(gi_t[:, :2 * H] + gh[:, :2 * H])          # one EUP push
        r = rz[:, :H]
        z = rz[:, H:]
        n = jnp.tanh(gi_t[:, 2 * H:3 * H] + r * gh[:, 2 * H:3 * H])
        return (1.0 - z) * n + z * h

    h = jnp.zeros((B, H), jnp.float32)     # hc=None -> zero init

    # --- HistoryCapturer: only its final (per-sequence) hidden state is used.
    for t in range(Th):                    # fully unrolled (static)
        h_new = gru_step(h, gi_his[t * B:(t + 1) * B], whh_h)
        h = jnp.where(his_valid[t], h_new, h)    # freeze past sequence end

    # --- CurrentCapturer: seeded with the history final hidden state.
    outs = []
    for t in range(Tc):                    # fully unrolled (static)
        h_new = gru_step(h, gi_cur[t * B:(t + 1) * B], whh_c)
        h = jnp.where(cur_valid[t], h_new, h)
        outs.append(jnp.where(cur_valid[t], h_new, 0.0))

    # Single lane-dense store ([B, Tc*H], Tc*H multiple of 128), off the chain.
    out_ref[...] = jnp.concatenate(outs, axis=1)
    hc_ref[...] = h                        # final hidden, [B, H]


def init_gru_params(key, input_dim, hidden_dim):
    """PyTorch-layout single-layer GRU params, uniform(-1/sqrt(H), 1/sqrt(H)).

    Returns (w_ih [3H,D], w_hh [3H,H], b_ih [3H], b_hh [3H]); gate order (r,z,n).
    """
    k = 1.0 / (hidden_dim ** 0.5)
    k0, k1, k2, k3 = jax.random.split(key, 4)
    wih = jax.random.uniform(k0, (3 * hidden_dim, input_dim), jnp.float32, -k, k)
    whh = jax.random.uniform(k1, (3 * hidden_dim, hidden_dim), jnp.float32, -k, k)
    bih = jax.random.uniform(k2, (3 * hidden_dim,), jnp.float32, -k, k)
    bhh = jax.random.uniform(k3, (3 * hidden_dim,), jnp.float32, -k, k)
    return wih, whh, bih, bhh


def pack_session_params(hist_params, cur_params):
    """One-time packing (call ONCE at init; outside the jitted forward).

    Produces:
      wih   [2D, 2*GW] bf16  block-diag(wih_hist, wih_cur), lane-padded gates
      bi    [1, 2*GW]  f32   b_ih (all gates) + b_hh (r, z) for both RNNs
      whh_h [H+1, GW]  f32   recurrent weight, row H = b_hh_n (hist)
      whh_c [H+1, GW]  f32   recurrent weight, row H = b_hh_n (cur)
    Gate order (r, z, n); GW is 3H rounded up to a multiple of 128 lanes.
    """
    hist_params = [jnp.asarray(p, jnp.float32) for p in hist_params]
    cur_params = [jnp.asarray(p, jnp.float32) for p in cur_params]
    H = hist_params[1].shape[1]
    D = hist_params[0].shape[1]
    GW = ((3 * H + 127) // 128) * 128

    def pack_one(wih, whh, bih, bhh):
        wih_cat = wih.T                                  # [D, 3H]
        whh_cat = whh.T                                  # [H, 3H]
        b_in = bih + jnp.concatenate([bhh[:2 * H], jnp.zeros((H,), jnp.float32)])
        wih_pad = jnp.zeros((D, GW), jnp.float32).at[:, :3 * H].set(wih_cat)
        whh_aug = jnp.zeros((H + 1, GW), jnp.float32)
        whh_aug = whh_aug.at[:H, :3 * H].set(whh_cat)
        whh_aug = whh_aug.at[H, 2 * H:3 * H].set(bhh[2 * H:])   # fold b_hh_n
        b_in_pad = jnp.zeros((1, GW), jnp.float32).at[:, :3 * H].set(b_in)
        return wih_pad, whh_aug, b_in_pad

    wih_h_p, whh_h_aug, bi_h = pack_one(*hist_params)
    wih_c_p, whh_c_aug, bi_c = pack_one(*cur_params)

    # Block-diagonal merge of the two hoisted input-path matmuls.
    wih_blk = jnp.zeros((2 * D, 2 * GW), jnp.float32)
    wih_blk = wih_blk.at[:D, :GW].set(wih_h_p).at[D:, GW:].set(wih_c_p)
    bi_blk = jnp.concatenate([bi_h, bi_c], axis=1)       # [1, 2*GW]
    return dict(wih=wih_blk.astype(jnp.bfloat16), bi=bi_blk,
                whh_h=whh_h_aug, whh_c=whh_c_aug)


@jax.jit
def session_capturer_forward(his_in, cur_in, his_len, cur_len, packed):
    """his_in: [B, Th, D], cur_in: [B, Tc, D] (batch_first, like PyTorch).

    Returns (current_unpack [B, Tc, H] with padded steps zeroed, hc [1, B, H]).
    """
    B, Th, _ = his_in.shape
    _, Tc, _ = cur_in.shape
    H = packed["whh_h"].shape[0] - 1
    B_pad = ((B + 7) // 8) * 8              # 8-sublane alignment
    Tmax = max(Th, Tc)

    # Pad batch to 8 sublanes (padded rows get length 0 -> sliced off below)
    # and time to Tmax so both RNNs' inputs can share one block-diag matmul.
    def prep(x, T):
        x = jnp.asarray(x, jnp.float32)
        x = jnp.pad(x, ((0, B_pad - B), (0, Tmax - T), (0, 0)))
        return jnp.transpose(x, (1, 0, 2)).reshape(Tmax * B_pad, -1)

    his_x = prep(his_in, Th)
    cur_x = prep(cur_in, Tc)
    x = jnp.concatenate([his_x, cur_x], axis=1).astype(jnp.bfloat16)  # [Tmax*B_pad, 2D]

    his_len2 = jnp.pad(jnp.asarray(his_len, jnp.int32).reshape(B, 1),
                       ((0, B_pad - B), (0, 0)))
    cur_len2 = jnp.pad(jnp.asarray(cur_len, jnp.int32).reshape(B, 1),
                       ((0, B_pad - B), (0, 0)))

    kernel = functools.partial(session_gru_kernel, Th=Th, Tc=Tc)
    vmem = pl.BlockSpec(memory_space=pltpu.MemorySpace.VMEM)
    out_slab, hc_pad = pl.pallas_call(
        kernel,
        out_shape=(jax.ShapeDtypeStruct((B_pad, Tc * H), jnp.float32),
                   jax.ShapeDtypeStruct((B_pad, H), jnp.float32)),
        in_specs=[vmem] * 7,
        out_specs=(vmem, vmem),
    )(x, his_len2, cur_len2,
      packed["wih"], packed["bi"], packed["whh_h"], packed["whh_c"])

    current_unpack = out_slab.reshape(B_pad, Tc, H)[:B]
    current_hc = hc_pad[:B][None]                                    # [1, B, H]
    return current_unpack, current_hc


def reference_forward(his_in, cur_in, his_len, cur_len, hist_params, cur_params):
    """Pure-JAX reference mirroring torch.nn.GRU + packed-sequence semantics."""
    def cell(x, h, params):
        wih, whh, bih, bhh = params
        H = whh.shape[1]
        gi = x @ wih.T + bih
        gh = h @ whh.T + bhh
        r = jax.nn.sigmoid(gi[:, :H] + gh[:, :H])
        z = jax.nn.sigmoid(gi[:, H:2 * H] + gh[:, H:2 * H])
        n = jnp.tanh(gi[:, 2 * H:] + r * gh[:, 2 * H:])
        return (1.0 - z) * n + z * h

    B = his_in.shape[0]
    H = hist_params[1].shape[1]
    lh = jnp.asarray(his_len, jnp.int32)[:, None]
    lc = jnp.asarray(cur_len, jnp.int32)[:, None]
    h = jnp.zeros((B, H), jnp.float32)
    for t in range(his_in.shape[1]):
        hn = cell(his_in[:, t].astype(jnp.float32), h, hist_params)
        h = jnp.where(t < lh, hn, h)
    outs = []
    for t in range(cur_in.shape[1]):
        hn = cell(cur_in[:, t].astype(jnp.float32), h, cur_params)
        h = jnp.where(t < lc, hn, h)
        outs.append(jnp.where(t < lc, hn, 0.0))
    return jnp.stack(outs, axis=1), h[None]


if __name__ == "__main__":
    B, Th, Tc, D, H = 2, 8, 8, 16, 32     # RNN_input_dim=16, RNN_hid_dim=32

    key = jax.random.PRNGKey(0)
    k_his, k_cur, k_hp, k_cp = jax.random.split(key, 4)
    his_in = jax.random.normal(k_his, (B, Th, D), jnp.float32)
    cur_in = jax.random.normal(k_cur, (B, Tc, D), jnp.float32)
    his_len = jnp.array([Th, 5], jnp.int32)   # len_batch[0]
    cur_len = jnp.array([Tc, 6], jnp.int32)   # len_batch[1]

    hist_params = init_gru_params(k_hp, D, H)   # HistoryCapturer weights
    cur_params = init_gru_params(k_cp, D, H)    # CurrentCapturer weights

    # One-time packing (hoisted out of the forward path, per the review).
    packed = pack_session_params(hist_params, cur_params)

    current_unpack, current_hc = session_capturer_forward(
        his_in, cur_in, his_len, cur_len, packed)
    jax.block_until_ready((current_unpack, current_hc))

    assert current_unpack.shape == (B, Tc, H)
    assert current_hc.shape == (1, B, H)

    ref_out, ref_hc = reference_forward(his_in, cur_in, his_len, cur_len,
                                        hist_params, cur_params)
    assert jnp.allclose(current_unpack, ref_out, atol=5e-2, rtol=5e-2)
    assert jnp.allclose(current_hc, ref_hc, atol=5e-2, rtol=5e-2)

    print("KERNEL_OK")
</pallas_src>

<mosaic_0001>
module attributes {stable_mosaic.version = 11 : i64} {
  func.func @session_gru_kernel(%arg0: memref<64x32xbf16, #tpu.memory_space<vmem>>, %arg1: memref<8x1xi32, #tpu.memory_space<vmem>>, %arg2: memref<8x1xi32, #tpu.memory_space<vmem>>, %arg3: memref<32x256xbf16, #tpu.memory_space<vmem>>, %arg4: memref<1x256xf32, #tpu.memory_space<vmem>>, %arg5: memref<33x128xf32, #tpu.memory_space<vmem>>, %arg6: memref<33x128xf32, #tpu.memory_space<vmem>>, %arg7: memref<8x256xf32, #tpu.memory_space<vmem>>, %arg8: memref<8x32xf32, #tpu.memory_space<vmem>>) attributes {dimension_semantics = [], scalar_prefetch = 0 : i64, scratch_operands = 0 : i64, tpu.core_type = #tpu.core_type<tc>} {
    %c0 = arith.constant 0 : index
    %c0_0 = arith.constant 0 : index
    %0 = vector.load %arg1[%c0, %c0_0] : memref<8x1xi32, #tpu.memory_space<vmem>>, vector<8x1xi32>
    %c0_1 = arith.constant 0 : index
    %c0_2 = arith.constant 0 : index
    %1 = vector.load %arg2[%c0_1, %c0_2] : memref<8x1xi32, #tpu.memory_space<vmem>>, vector<8x1xi32>
    %c0_3 = arith.constant 0 : index
    %c0_4 = arith.constant 0 : index
    %2 = vector.load %arg5[%c0_3, %c0_4] : memref<33x128xf32, #tpu.memory_space<vmem>>, vector<33x128xf32>
    %c0_5 = arith.constant 0 : index
    %c0_6 = arith.constant 0 : index
    %3 = vector.load %arg6[%c0_5, %c0_6] : memref<33x128xf32, #tpu.memory_space<vmem>>, vector<33x128xf32>
    %cst = arith.constant 1.000000e+00 : f32
    %4 = vector.broadcast %cst : f32 to vector<8x1xf32>
    %c0_7 = arith.constant 0 : index
    %c0_8 = arith.constant 0 : index
    %5 = vector.load %arg0[%c0_7, %c0_8] : memref<64x32xbf16, #tpu.memory_space<vmem>>, vector<64x32xbf16>
    %c0_9 = arith.constant 0 : index
    %c0_10 = arith.constant 0 : index
    %6 = vector.load %arg3[%c0_9, %c0_10] : memref<32x256xbf16, #tpu.memory_space<vmem>>, vector<32x256xbf16>
    %cst_11 = arith.constant dense<0.000000e+00> : vector<64x256xf32>
    %7 = tpu.matmul %5, %6, %cst_11 {dimension_numbers = #tpu.dot_dimension_numbers<[1], [0], [0], [1], [0, 0, 1, 1], [], []>} : vector<64x32xbf16>, vector<32x256xbf16>, vector<64x256xf32> -> vector<64x256xf32>
    %c0_12 = arith.constant 0 : index
    %c0_13 = arith.constant 0 : index
    %8 = vector.load %arg4[%c0_12, %c0_13] : memref<1x256xf32, #tpu.memory_space<vmem>>, vector<1x256xf32>
    %9 = vector.broadcast %8 : vector<1x256xf32> to vector<64x256xf32>
    %10 = arith.addf %7, %9 : vector<64x256xf32>
    %11 = vector.extract_strided_slice %10 {offsets = [0, 0], sizes = [64, 128], strides = [1, 1]} : vector<64x256xf32> to vector<64x128xf32>
    %12 = vector.extract_strided_slice %10 {offsets = [0, 128], sizes = [64, 128], strides = [1, 1]} : vector<64x256xf32> to vector<64x128xf32>
    %c0_i32 = arith.constant 0 : i32
    %13 = vector.broadcast %c0_i32 : i32 to vector<8x1xi32>
    %14 = arith.cmpi sgt, %0, %13 : vector<8x1xi32>
    %c1_i32 = arith.constant 1 : i32
    %15 = vector.broadcast %c1_i32 : i32 to vector<8x1xi32>
    %16 = arith.cmpi sgt, %0, %15 : vector<8x1xi32>
    %c2_i32 = arith.constant 2 : i32
    %17 = vector.broadcast %c2_i32 : i32 to vector<8x1xi32>
    %18 = arith.cmpi sgt, %0, %17 : vector<8x1xi32>
    %c3_i32 = arith.constant 3 : i32
    %19 = vector.broadcast %c3_i32 : i32 to vector<8x1xi32>
    %20 = arith.cmpi sgt, %0, %19 : vector<8x1xi32>
    %c4_i32 = arith.constant 4 : i32
    %21 = vector.broadcast %c4_i32 : i32 to vector<8x1xi32>
    %22 = arith.cmpi sgt, %0, %21 : vector<8x1xi32>
    %c5_i32 = arith.constant 5 : i32
    %23 = vector.broadcast %c5_i32 : i32 to vector<8x1xi32>
    %24 = arith.cmpi sgt, %0, %23 : vector<8x1xi32>
    %c6_i32 = arith.constant 6 : i32
    %25 = vector.broadcast %c6_i32 : i32 to vector<8x1xi32>
    %26 = arith.cmpi sgt, %0, %25 : vector<8x1xi32>
    %c7_i32 = arith.constant 7 : i32
    %27 = vector.broadcast %c7_i32 : i32 to vector<8x1xi32>
    %28 = arith.cmpi sgt, %0, %27 : vector<8x1xi32>
    %c0_i32_14 = arith.constant 0 : i32
    %29 = vector.broadcast %c0_i32_14 : i32 to vector<8x1xi32>
    %30 = arith.cmpi sgt, %1, %29 : vector<8x1xi32>
    %c1_i32_15 = arith.constant 1 : i32
    %31 = vector.broadcast %c1_i32_15 : i32 to vector<8x1xi32>
    %32 = arith.cmpi sgt, %1, %31 : vector<8x1xi32>
    %c2_i32_16 = arith.constant 2 : i32
    %33 = vector.broadcast %c2_i32_16 : i32 to vector<8x1xi32>
    %34 = arith.cmpi sgt, %1, %33 : vector<8x1xi32>
    %c3_i32_17 = arith.constant 3 : i32
    %35 = vector.broadcast %c3_i32_17 : i32 to vector<8x1xi32>
    %36 = arith.cmpi sgt, %1, %35 : vector<8x1xi32>
    %c4_i32_18 = arith.constant 4 : i32
    %37 = vector.broadcast %c4_i32_18 : i32 to vector<8x1xi32>
    %38 = arith.cmpi sgt, %1, %37 : vector<8x1xi32>
    %c5_i32_19 = arith.constant 5 : i32
    %39 = vector.broadcast %c5_i32_19 : i32 to vector<8x1xi32>
    %40 = arith.cmpi sgt, %1, %39 : vector<8x1xi32>
    %c6_i32_20 = arith.constant 6 : i32
    %41 = vector.broadcast %c6_i32_20 : i32 to vector<8x1xi32>
    %42 = arith.cmpi sgt, %1, %41 : vector<8x1xi32>
    %c7_i32_21 = arith.constant 7 : i32
    %43 = vector.broadcast %c7_i32_21 : i32 to vector<8x1xi32>
    %44 = arith.cmpi sgt, %1, %43 : vector<8x1xi32>
    %cst_22 = arith.constant 0.000000e+00 : f32
    %45 = vector.broadcast %cst_22 : f32 to vector<8x32xf32>
    %46 = vector.extract_strided_slice %11 {offsets = [0, 0], sizes = [8, 128], strides = [1, 1]} : vector<64x128xf32> to vector<8x128xf32>
    %47 = tpu.concatenate %45, %4 in 1 : vector<8x32xf32>, vector<8x1xf32> -> vector<8x33xf32>
    %cst_23 = arith.constant dense<0.000000e+00> : vector<8x128xf32>
    %48 = tpu.matmul %47, %2, %cst_23 {dimension_numbers = #tpu.dot_dimension_numbers<[1], [0], [0], [1], [0, 0, 1, 1], [], []>} : vector<8x33xf32>, vector<33x128xf32>, vector<8x128xf32> -> vector<8x128xf32>
    %49 = vector.extract_strided_slice %46 {offsets = [0, 0], sizes = [8, 64], strides = [1, 1]} : vector<8x128xf32> to vector<8x64xf32>
    %50 = vector.extract_strided_slice %48 {offsets = [0, 0], sizes = [8, 64], strides = [1, 1]} : vector<8x128xf32> to vector<8x64xf32>
    %51 = arith.addf %49, %50 : vector<8x64xf32>
    %52 = arith.negf %51 : vector<8x64xf32>
    %53 = math.exp %52 : vector<8x64xf32>
    %cst_24 = arith.constant 1.000000e+00 : f32
    %54 = vector.broadcast %cst_24 : f32 to vector<8x64xf32>
    %55 = arith.addf %54, %53 : vector<8x64xf32>
    %56 = arith.divf %54, %55 : vector<8x64xf32>
    %57 = vector.extract_strided_slice %56 {offsets = [0, 0], sizes = [8, 32], strides = [1, 1]} : vector<8x64xf32> to vector<8x32xf32>
    %58 = vector.extract_strided_slice %56 {offsets = [0, 32], sizes = [8, 32], strides = [1, 1]} : vector<8x64xf32> to vector<8x32xf32>
    %59 = vector.extract_strided_slice %46 {offsets = [0, 64], sizes = [8, 32], strides = [1, 1]} : vector<8x128xf32> to vector<8x32xf32>
    %60 = vector.extract_strided_slice %48 {offsets = [0, 64], sizes = [8, 32], strides = [1, 1]} : vector<8x128xf32> to vector<8x32xf32>
    %61 = arith.mulf %57, %60 : vector<8x32xf32>
    %62 = arith.addf %59, %61 : vector<8x32xf32>
    %63 = math.tanh %62 : vector<8x32xf32>
    %cst_25 = arith.constant 1.000000e+00 : f32
    %64 = vector.broadcast %cst_25 : f32 to vector<8x32xf32>
    %65 = arith.subf %64, %58 : vector<8x32xf32>
    %66 = arith.mulf %65, %63 : vector<8x32xf32>
    %67 = arith.mulf %58, %45 : vector<8x32xf32>
    %68 = arith.addf %66, %67 : vector<8x32xf32>
    %69 = vector.shape_cast %14 : vector<8x1xi1> to vector<8x1xi1>
    %70 = vector.broadcast %69 : vector<8x1xi1> to vector<8x32xi1>
    %71 = arith.select %70, %68, %45 : vector<8x32xi1>, vector<8x32xf32>
    %72 = vector.extract_strided_slice %11 {offsets = [8, 0], sizes = [8, 128], strides = [1, 1]} : vector<64x128xf32> to vector<8x128xf32>
    %73 = tpu.concatenate %71, %4 in 1 : vector<8x32xf32>, vector<8x1xf32> -> vector<8x33xf32>
    %cst_26 = arith.constant dense<0.000000e+00> : vector<8x128xf32>
    %74 = tpu.matmul %73, %2, %cst_26 {dimension_numbers = #tpu.dot_dimension_numbers<[1], [0], [0], [1], [0, 0, 1, 1], [], []>} : vector<8x33xf32>, vector<33x128xf32>, vector<8x128xf32> -> vector<8x128xf32>
    %75 = vector.extract_strided_slice %72 {offsets = [0, 0], sizes = [8, 64], strides = [1, 1]} : vector<8x128xf32> to vector<8x64xf32>
    %76 = vector.extract_strided_slice %74 {offsets = [0, 0], sizes = [8, 64], strides = [1, 1]} : vector<8x128xf32> to vector<8x64xf32>
    %77 = arith.addf %75, %76 : vector<8x64xf32>
    %78 = arith.negf %77 : vector<8x64xf32>
    %79 = math.exp %78 : vector<8x64xf32>
    %cst_27 = arith.constant 1.000000e+00 : f32
    %80 = vector.broadcast %cst_27 : f32 to vector<8x64xf32>
    %81 = arith.addf %80, %79 : vector<8x64xf32>
    %82 = arith.divf %80, %81 : vector<8x64xf32>
    %83 = vector.extract_strided_slice %82 {offsets = [0, 0], sizes = [8, 32], strides = [1, 1]} : vector<8x64xf32> to vector<8x32xf32>
    %84 = vector.extract_strided_slice %82 {offsets = [0, 32], sizes = [8, 32], strides = [1, 1]} : vector<8x64xf32> to vector<8x32xf32>
    %85 = vector.extract_strided_slice %72 {offsets = [0, 64], sizes = [8, 32], strides = [1, 1]} : vector<8x128xf32> to vector<8x32xf32>
    %86 = vector.extract_strided_slice %74 {offsets = [0, 64], sizes = [8, 32], strides = [1, 1]} : vector<8x128xf32> to vector<8x32xf32>
    %87 = arith.mulf %83, %86 : vector<8x32xf32>
    %88 = arith.addf %85, %87 : vector<8x32xf32>
    %89 = math.tanh %88 : vector<8x32xf32>
    %cst_28 = arith.constant 1.000000e+00 : f32
    %90 = vector.broadcast %cst_28 : f32 to vector<8x32xf32>
    %91 = arith.subf %90, %84 : vector<8x32xf32>
    %92 = arith.mulf %91, %89 : vector<8x32xf32>
    %93 = arith.mulf %84, %71 : vector<8x32xf32>
    %94 = arith.addf %92, %93 : vector<8x32xf32>
    %95 = vector.shape_cast %16 : vector<8x1xi1> to vector<8x1xi1>
    %96 = vector.broadcast %95 : vector<8x1xi1> to vector<8x32xi1>
    %97 = arith.select %96, %94, %71 : vector<8x32xi1>, vector<8x32xf32>
    %98 = vector.extract_strided_slice %11 {offsets = [16, 0], sizes = [8, 128], strides = [1, 1]} : vector<64x128xf32> to vector<8x128xf32>
    %99 = tpu.concatenate %97, %4 in 1 : vector<8x32xf32>, vector<8x1xf32> -> vector<8x33xf32>
    %cst_29 = arith.constant dense<0.000000e+00> : vector<8x128xf32>
    %100 = tpu.matmul %99, %2, %cst_29 {dimension_numbers = #tpu.dot_dimension_numbers<[1], [0], [0], [1], [0, 0, 1, 1], [], []>} : vector<8x33xf32>, vector<33x128xf32>, vector<8x128xf32> -> vector<8x128xf32>
    %101 = vector.extract_strided_slice %98 {offsets = [0, 0], sizes = [8, 64], strides = [1, 1]} : vector<8x128xf32> to vector<8x64xf32>
    %102 = vector.extract_strided_slice %100 {offsets = [0, 0], sizes = [8, 64], strides = [1, 1]} : vector<8x128xf32> to vector<8x64xf32>
    %103 = arith.addf %101, %102 : vector<8x64xf32>
    %104 = arith.negf %103 : vector<8x64xf32>
    %105 = math.exp %104 : vector<8x64xf32>
    %cst_30 = arith.constant 1.000000e+00 : f32
    %106 = vector.broadcast %cst_30 : f32 to vector<8x64xf32>
    %107 = arith.addf %106, %105 : vector<8x64xf32>
    %108 = arith.divf %106, %107 : vector<8x64xf32>
    %109 = vector.extract_strided_slice %108 {offsets = [0, 0], sizes = [8, 32], strides = [1, 1]} : vector<8x64xf32> to vector<8x32xf32>
    %110 = vector.extract_strided_slice %108 {offsets = [0, 32], sizes = [8, 32], strides = [1, 1]} : vector<8x64xf32> to vector<8x32xf32>
    %111 = vector.extract_strided_slice %98 {offsets = [0, 64], sizes = [8, 32], strides = [1, 1]} : vector<8x128xf32> to vector<8x32xf32>
    %112 = vector.extract_strided_slice %100 {offsets = [0, 64], sizes = [8, 32], strides = [1, 1]} : vector<8x128xf32> to vector<8x32xf32>
    %113 = arith.mulf %109, %112 : vector<8x32xf32>
    %114 = arith.addf %111, %113 : vector<8x32xf32>
    %115 = math.tanh %114 : vector<8x32xf32>
    %cst_31 = arith.constant 1.000000e+00 : f32
    %116 = vector.broadcast %cst_31 : f32 to vector<8x32xf32>
    %117 = arith.subf %116, %110 : vector<8x32xf32>
    %118 = arith.mulf %117, %115 : vector<8x32xf32>
    %119 = arith.mulf %110, %97 : vector<8x32xf32>
    %120 = arith.addf %118, %119 : vector<8x32xf32>
    %121 = vector.shape_cast %18 : vector<8x1xi1> to vector<8x1xi1>
    %122 = vector.broadcast %121 : vector<8x1xi1> to vector<8x32xi1>
    %123 = arith.select %122, %120, %97 : vector<8x32xi1>, vector<8x32xf32>
    %124 = vector.extract_strided_slice %11 {offsets = [24, 0], sizes = [8, 128], strides = [1, 1]} : vector<64x128xf32> to vector<8x128xf32>
    %125 = tpu.concatenate %123, %4 in 1 : vector<8x32xf32>, vector<8x1xf32> -> vector<8x33xf32>
    %cst_32 = arith.constant dense<0.000000e+00> : vector<8x128xf32>
    %126 = tpu.matmul %125, %2, %cst_32 {dimension_numbers = #tpu.dot_dimension_numbers<[1], [0], [0], [1], [0, 0, 1, 1], [], []>} : vector<8x33xf32>, vector<33x128xf32>, vector<8x128xf32> -> vector<8x128xf32>
    %127 = vector.extract_strided_slice %124 {offsets = [0, 0], sizes = [8, 64], strides = [1, 1]} : vector<8x128xf32> to vector<8x64xf32>
    %128 = vector.extract_strided_slice %126 {offsets = [0, 0], sizes = [8, 64], strides = [1, 1]} : vector<8x128xf32> to vector<8x64xf32>
    %129 = arith.addf %127, %128 : vector<8x64xf32>
    %130 = arith.negf %129 : vector<8x64xf32>
    %131 = math.exp %130 : vector<8x64xf32>
    %cst_33 = arith.constant 1.000000e+00 : f32
    %132 = vector.broadcast %cst_33 : f32 to vector<8x64xf32>
    %133 = arith.addf %132, %131 : vector<8x64xf32>
    %134 = arith.divf %132, %133 : vector<8x64xf32>
    %135 = vector.extract_strided_slice %134 {offsets = [0, 0], sizes = [8, 32], strides = [1, 1]} : vector<8x64xf32> to vector<8x32xf32>
    %136 = vector.extract_strided_slice %134 {offsets = [0, 32], sizes = [8, 32], strides = [1, 1]} : vector<8x64xf32> to vector<8x32xf32>
    %137 = vector.extract_strided_slice %124 {offsets = [0, 64], sizes = [8, 32], strides = [1, 1]} : vector<8x128xf32> to vector<8x32xf32>
    %138 = vector.extract_strided_slice %126 {offsets = [0, 64], sizes = [8, 32], strides = [1, 1]} : vector<8x128xf32> to vector<8x32xf32>
    %139 = arith.mulf %135, %138 : vector<8x32xf32>
    %140 = arith.addf %137, %139 : vector<8x32xf32>
    %141 = math.tanh %140 : vector<8x32xf32>
    %cst_34 = arith.constant 1.000000e+00 : f32
    %142 = vector.broadcast %cst_34 : f32 to vector<8x32xf32>
    %143 = arith.subf %142, %136 : vector<8x32xf32>
    %144 = arith.mulf %143, %141 : vector<8x32xf32>
    %145 = arith.mulf %136, %123 : vector<8x32xf32>
    %146 = arith.addf %144, %145 : vector<8x32xf32>
    %147 = vector.shape_cast %20 : vector<8x1xi1> to vector<8x1xi1>
    %148 = vector.broadcast %147 : vector<8x1xi1> to vector<8x32xi1>
    %149 = arith.select %148, %146, %123 : vector<8x32xi1>, vector<8x32xf32>
    %150 = vector.extract_strided_slice %11 {offsets = [32, 0], sizes = [8, 128], strides = [1, 1]} : vector<64x128xf32> to vector<8x128xf32>
    %151 = tpu.concatenate %149, %4 in 1 : vector<8x32xf32>, vector<8x1xf32> -> vector<8x33xf32>
    %cst_35 = arith.constant dense<0.000000e+00> : vector<8x128xf32>
    %152 = tpu.matmul %151, %2, %cst_35 {dimension_numbers = #tpu.dot_dimension_numbers<[1], [0], [0], [1], [0, 0, 1, 1], [], []>} : vector<8x33xf32>, vector<33x128xf32>, vector<8x128xf32> -> vector<8x128xf32>
    %153 = vector.extract_strided_slice %150 {offsets = [0, 0], sizes = [8, 64], strides = [1, 1]} : vector<8x128xf32> to vector<8x64xf32>
    %154 = vector.extract_strided_slice %152 {offsets = [0, 0], sizes = [8, 64], strides = [1, 1]} : vector<8x128xf32> to vector<8x64xf32>
    %155 = arith.addf %153, %154 : vector<8x64xf32>
    %156 = arith.negf %155 : vector<8x64xf32>
    %157 = math.exp %156 : vector<8x64xf32>
    %cst_36 = arith.constant 1.000000e+00 : f32
    %158 = vector.broadcast %cst_36 : f32 to vector<8x64xf32>
    %159 = arith.addf %158, %157 : vector<8x64xf32>
    %160 = arith.divf %158, %159 : vector<8x64xf32>
    %161 = vector.extract_strided_slice %160 {offsets = [0, 0], sizes = [8, 32], strides = [1, 1]} : vector<8x64xf32> to vector<8x32xf32>
    %162 = vector.extract_strided_slice %160 {offsets = [0, 32], sizes = [8, 32], strides = [1, 1]} : vector<8x64xf32> to vector<8x32xf32>
    %163 = vector.extract_strided_slice %150 {offsets = [0, 64], sizes = [8, 32], strides = [1, 1]} : vector<8x128xf32> to vector<8x32xf32>
    %164 = vector.extract_strided_slice %152 {offsets = [0, 64], sizes = [8, 32], strides = [1, 1]} : vector<8x128xf32> to vector<8x32xf32>
    %165 = arith.mulf %161, %164 : vector<8x32xf32>
    %166 = arith.addf %163, %165 : vector<8x32xf32>
    %167 = math.tanh %166 : vector<8x32xf32>
    %cst_37 = arith.constant 1.000000e+00 : f32
    %168 = vector.broadcast %cst_37 : f32 to vector<8x32xf32>
    %169 = arith.subf %168, %162 : vector<8x32xf32>
    %170 = arith.mulf %169, %167 : vector<8x32xf32>
    %171 = arith.mulf %162, %149 : vector<8x32xf32>
    %172 = arith.addf %170, %171 : vector<8x32xf32>
    %173 = vector.shape_cast %22 : vector<8x1xi1> to vector<8x1xi1>
    %174 = vector.broadcast %173 : vector<8x1xi1> to vector<8x32xi1>
    %175 = arith.select %174, %172, %149 : vector<8x32xi1>, vector<8x32xf32>
    %176 = vector.extract_strided_slice %11 {offsets = [40, 0], sizes = [8, 128], strides = [1, 1]} : vector<64x128xf32> to vector<8x128xf32>
    %177 = tpu.concatenate %175, %4 in 1 : vector<8x32xf32>, vector<8x1xf32> -> vector<8x33xf32>
    %cst_38 = arith.constant dense<0.000000e+00> : vector<8x128xf32>
    %178 = tpu.matmul %177, %2, %cst_38 {dimension_numbers = #tpu.dot_dimension_numbers<[1], [0], [0], [1], [0, 0, 1, 1], [], []>} : vector<8x33xf32>, vector<33x128xf32>, vector<8x128xf32> -> vector<8x128xf32>
    %179 = vector.extract_strided_slice %176 {offsets = [0, 0], sizes = [8, 64], strides = [1, 1]} : vector<8x128xf32> to vector<8x64xf32>
    %180 = vector.extract_strided_slice %178 {offsets = [0, 0], sizes = [8, 64], strides = [1, 1]} : vector<8x128xf32> to vector<8x64xf32>
    %181 = arith.addf %179, %180 : vector<8x64xf32>
    %182 = arith.negf %181 : vector<8x64xf32>
    %183 = math.exp %182 : vector<8x64xf32>
    %cst_39 = arith.constant 1.000000e+00 : f32
    %184 = vector.broadcast %cst_39 : f32 to vector<8x64xf32>
    %185 = arith.addf %184, %183 : vector<8x64xf32>
    %186 = arith.divf %184, %185 : vector<8x64xf32>
    %187 = vector.extract_strided_slice %186 {offsets = [0, 0], sizes = [8, 32], strides = [1, 1]} : vector<8x64xf32> to vector<8x32xf32>
    %188 = vector.extract_strided_slice %186 {offsets = [0, 32], sizes = [8, 32], strides = [1, 1]} : vector<8x64xf32> to vector<8x32xf32>
    %189 = vector.extract_strided_slice %176 {offsets = [0, 64], sizes = [8, 32], strides = [1, 1]} : vector<8x128xf32> to vector<8x32xf32>
    %190 = vector.extract_strided_slice %178 {offsets = [0, 64], sizes = [8, 32], strides = [1, 1]} : vector<8x128xf32> to vector<8x32xf32>
    %191 = arith.mulf %187, %190 : vector<8x32xf32>
    %192 = arith.addf %189, %191 : vector<8x32xf32>
    %193 = math.tanh %192 : vector<8x32xf32>
    %cst_40 = arith.constant 1.000000e+00 : f32
    %194 = vector.broadcast %cst_40 : f32 to vector<8x32xf32>
    %195 = arith.subf %194, %188 : vector<8x32xf32>
    %196 = arith.mulf %195, %193 : vector<8x32xf32>
    %197 = arith.mulf %188, %175 : vector<8x32xf32>
    %198 = arith.addf %196, %197 : vector<8x32xf32>
    %199 = vector.shape_cast %24 : vector<8x1xi1> to vector<8x1xi1>
    %200 = vector.broadcast %199 : vector<8x1xi1> to vector<8x32xi1>
    %201 = arith.select %200, %198, %175 : vector<8x32xi1>, vector<8x32xf32>
    %202 = vector.extract_strided_slice %11 {offsets = [48, 0], sizes = [8, 128], strides = [1, 1]} : vector<64x128xf32> to vector<8x128xf32>
    %203 = tpu.concatenate %201, %4 in 1 : vector<8x32xf32>, vector<8x1xf32> -> vector<8x33xf32>
    %cst_41 = arith.constant dense<0.000000e+00> : vector<8x128xf32>
    %204 = tpu.matmul %203, %2, %cst_41 {dimension_numbers = #tpu.dot_dimension_numbers<[1], [0], [0], [1], [0, 0, 1, 1], [], []>} : vector<8x33xf32>, vector<33x128xf32>, vector<8x128xf32> -> vector<8x128xf32>
    %205 = vector.extract_strided_slice %202 {offsets = [0, 0], sizes = [8, 64], strides = [1, 1]} : vector<8x128xf32> to vector<8x64xf32>
    %206 = vector.extract_strided_slice %204 {offsets = [0, 0], sizes = [8, 64], strides = [1, 1]} : vector<8x128xf32> to vector<8x64xf32>
    %207 = arith.addf %205, %206 : vector<8x64xf32>
    %208 = arith.negf %207 : vector<8x64xf32>
    %209 = math.exp %208 : vector<8x64xf32>
    %cst_42 = arith.constant 1.000000e+00 : f32
    %210 = vector.broadcast %cst_42 : f32 to vector<8x64xf32>
    %211 = arith.addf %210, %209 : vector<8x64xf32>
    %212 = arith.divf %210, %211 : vector<8x64xf32>
    %213 = vector.extract_strided_slice %212 {offsets = [0, 0], sizes = [8, 32], strides = [1, 1]} : vector<8x64xf32> to vector<8x32xf32>
    %214 = vector.extract_strided_slice %212 {offsets = [0, 32], sizes = [8, 32], strides = [1, 1]} : vector<8x64xf32> to vector<8x32xf32>
    %215 = vector.extract_strided_slice %202 {offsets = [0, 64], sizes = [8, 32], strides = [1, 1]} : vector<8x128xf32> to vector<8x32xf32>
    %216 = vector.extract_strided_slice %204 {offsets = [0, 64], sizes = [8, 32], strides = [1, 1]} : vector<8x128xf32> to vector<8x32xf32>
    %217 = arith.mulf %213, %216 : vector<8x32xf32>
    %218 = arith.addf %215, %217 : vector<8x32xf32>
    %219 = math.tanh %218 : vector<8x32xf32>
    %cst_43 = arith.constant 1.000000e+00 : f32
    %220 = vector.broadcast %cst_43 : f32 to vector<8x32xf32>
    %221 = arith.subf %220, %214 : vector<8x32xf32>
    %222 = arith.mulf %221, %219 : vector<8x32xf32>
    %223 = arith.mulf %214, %201 : vector<8x32xf32>
    %224 = arith.addf %222, %223 : vector<8x32xf32>
    %225 = vector.shape_cast %26 : vector<8x1xi1> to vector<8x1xi1>
    %226 = vector.broadcast %225 : vector<8x1xi1> to vector<8x32xi1>
    %227 = arith.select %226, %224, %201 : vector<8x32xi1>, vector<8x32xf32>
    %228 = vector.extract_strided_slice %11 {offsets = [56, 0], sizes = [8, 128], strides = [1, 1]} : vector<64x128xf32> to vector<8x128xf32>
    %229 = tpu.concatenate %227, %4 in 1 : vector<8x32xf32>, vector<8x1xf32> -> vector<8x33xf32>
    %cst_44 = arith.constant dense<0.000000e+00> : vector<8x128xf32>
    %230 = tpu.matmul %229, %2, %cst_44 {dimension_numbers = #tpu.dot_dimension_numbers<[1], [0], [0], [1], [0, 0, 1, 1], [], []>} : vector<8x33xf32>, vector<33x128xf32>, vector<8x128xf32> -> vector<8x128xf32>
    %231 = vector.extract_strided_slice %228 {offsets = [0, 0], sizes = [8, 64], strides = [1, 1]} : vector<8x128xf32> to vector<8x64xf32>
    %232 = vector.extract_strided_slice %230 {offsets = [0, 0], sizes = [8, 64], strides = [1, 1]} : vector<8x128xf32> to vector<8x64xf32>
    %233 = arith.addf %231, %232 : vector<8x64xf32>
    %234 = arith.negf %233 : vector<8x64xf32>
    %235 = math.exp %234 : vector<8x64xf32>
    %cst_45 = arith.constant 1.000000e+00 : f32
    %236 = vector.broadcast %cst_45 : f32 to vector<8x64xf32>
    %237 = arith.addf %236, %235 : vector<8x64xf32>
    %238 = arith.divf %236, %237 : vector<8x64xf32>
    %239 = vector.extract_strided_slice %238 {offsets = [0, 0], sizes = [8, 32], strides = [1, 1]} : vector<8x64xf32> to vector<8x32xf32>
    %240 = vector.extract_strided_slice %238 {offsets = [0, 32], sizes = [8, 32], strides = [1, 1]} : vector<8x64xf32> to vector<8x32xf32>
    %241 = vector.extract_strided_slice %228 {offsets = [0, 64], sizes = [8, 32], strides = [1, 1]} : vector<8x128xf32> to vector<8x32xf32>
    %242 = vector.extract_strided_slice %230 {offsets = [0, 64], sizes = [8, 32], strides = [1, 1]} : vector<8x128xf32> to vector<8x32xf32>
    %243 = arith.mulf %239, %242 : vector<8x32xf32>
    %244 = arith.addf %241, %243 : vector<8x32xf32>
    %245 = math.tanh %244 : vector<8x32xf32>
    %cst_46 = arith.constant 1.000000e+00 : f32
    %246 = vector.broadcast %cst_46 : f32 to vector<8x32xf32>
    %247 = arith.subf %246, %240 : vector<8x32xf32>
    %248 = arith.mulf %247, %245 : vector<8x32xf32>
    %249 = arith.mulf %240, %227 : vector<8x32xf32>
    %250 = arith.addf %248, %249 : vector<8x32xf32>
    %251 = vector.shape_cast %28 : vector<8x1xi1> to vector<8x1xi1>
    %252 = vector.broadcast %251 : vector<8x1xi1> to vector<8x32xi1>
    %253 = arith.select %252, %250, %227 : vector<8x32xi1>, vector<8x32xf32>
    %254 = vector.extract_strided_slice %12 {offsets = [0, 0], sizes = [8, 128], strides = [1, 1]} : vector<64x128xf32> to vector<8x128xf32>
    %255 = tpu.concatenate %253, %4 in 1 : vector<8x32xf32>, vector<8x1xf32> -> vector<8x33xf32>
    %cst_47 = arith.constant dense<0.000000e+00> : vector<8x128xf32>
    %256 = tpu.matmul %255, %3, %cst_47 {dimension_numbers = #tpu.dot_dimension_numbers<[1], [0], [0], [1], [0, 0, 1, 1], [], []>} : vector<8x33xf32>, vector<33x128xf32>, vector<8x128xf32> -> vector<8x128xf32>
    %257 = vector.extract_strided_slice %254 {offsets = [0, 0], sizes = [8, 64], strides = [1, 1]} : vector<8x128xf32> to vector<8x64xf32>
    %258 = vector.extract_strided_slice %256 {offsets = [0, 0], sizes = [8, 64], strides = [1, 1]} : vector<8x128xf32> to vector<8x64xf32>
    %259 = arith.addf %257, %258 : vector<8x64xf32>
    %260 = arith.negf %259 : vector<8x64xf32>
    %261 = math.exp %260 : vector<8x64xf32>
    %cst_48 = arith.constant 1.000000e+00 : f32
    %262 = vector.broadcast %cst_48 : f32 to vector<8x64xf32>
    %263 = arith.addf %262, %261 : vector<8x64xf32>
    %264 = arith.divf %262, %263 : vector<8x64xf32>
    %265 = vector.extract_strided_slice %264 {offsets = [0, 0], sizes = [8, 32], strides = [1, 1]} : vector<8x64xf32> to vector<8x32xf32>
    %266 = vector.extract_strided_slice %264 {offsets = [0, 32], sizes = [8, 32], strides = [1, 1]} : vector<8x64xf32> to vector<8x32xf32>
    %267 = vector.extract_strided_slice %254 {offsets = [0, 64], sizes = [8, 32], strides = [1, 1]} : vector<8x128xf32> to vector<8x32xf32>
    %268 = vector.extract_strided_slice %256 {offsets = [0, 64], sizes = [8, 32], strides = [1, 1]} : vector<8x128xf32> to vector<8x32xf32>
    %269 = arith.mulf %265, %268 : vector<8x32xf32>
    %270 = arith.addf %267, %269 : vector<8x32xf32>
    %271 = math.tanh %270 : vector<8x32xf32>
    %cst_49 = arith.constant 1.000000e+00 : f32
    %272 = vector.broadcast %cst_49 : f32 to vector<8x32xf32>
    %273 = arith.subf %272, %266 : vector<8x32xf32>
    %274 = arith.mulf %273, %271 : vector<8x32xf32>
    %275 = arith.mulf %266, %253 : vector<8x32xf32>
    %276 = arith.addf %274, %275 : vector<8x32xf32>
    %277 = vector.shape_cast %30 : vector<8x1xi1> to vector<8x1xi1>
    %278 = vector.broadcast %277 : vector<8x1xi1> to vector<8x32xi1>
    %279 = arith.select %278, %276, %253 : vector<8x32xi1>, vector<8x32xf32>
    %cst_50 = arith.constant 0.000000e+00 : f32
    %280 = vector.shape_cast %30 : vector<8x1xi1> to vector<8x1xi1>
    %281 = vector.broadcast %280 : vector<8x1xi1> to vector<8x32xi1>
    %282 = vector.broadcast %cst_50 : f32 to vector<8x32xf32>
    %283 = arith.select %281, %276, %282 : vector<8x32xi1>, vector<8x32xf32>
    %284 = vector.extract_strided_slice %12 {offsets = [8, 0], sizes = [8, 128], strides = [1, 1]} : vector<64x128xf32> to vector<8x128xf32>
    %285 = tpu.concatenate %279, %4 in 1 : vector<8x32xf32>, vector<8x1xf32> -> vector<8x33xf32>
    %cst_51 = arith.constant dense<0.000000e+00> : vector<8x128xf32>
    %286 = tpu.matmul %285, %3, %cst_51 {dimension_numbers = #tpu.dot_dimension_numbers<[1], [0], [0], [1], [0, 0, 1, 1], [], []>} : vector<8x33xf32>, vector<33x128xf32>, vector<8x128xf32> -> vector<8x128xf32>
    %287 = vector.extract_strided_slice %284 {offsets = [0, 0], sizes = [8, 64], strides = [1, 1]} : vector<8x128xf32> to vector<8x64xf32>
    %288 = vector.extract_strided_slice %286 {offsets = [0, 0], sizes = [8, 64], strides = [1, 1]} : vector<8x128xf32> to vector<8x64xf32>
    %289 = arith.addf %287, %288 : vector<8x64xf32>
    %290 = arith.negf %289 : vector<8x64xf32>
    %291 = math.exp %290 : vector<8x64xf32>
    %cst_52 = arith.constant 1.000000e+00 : f32
    %292 = vector.broadcast %cst_52 : f32 to vector<8x64xf32>
    %293 = arith.addf %292, %291 : vector<8x64xf32>
    %294 = arith.divf %292, %293 : vector<8x64xf32>
    %295 = vector.extract_strided_slice %294 {offsets = [0, 0], sizes = [8, 32], strides = [1, 1]} : vector<8x64xf32> to vector<8x32xf32>
    %296 = vector.extract_strided_slice %294 {offsets = [0, 32], sizes = [8, 32], strides = [1, 1]} : vector<8x64xf32> to vector<8x32xf32>
    %297 = vector.extract_strided_slice %284 {offsets = [0, 64], sizes = [8, 32], strides = [1, 1]} : vector<8x128xf32> to vector<8x32xf32>
    %298 = vector.extract_strided_slice %286 {offsets = [0, 64], sizes = [8, 32], strides = [1, 1]} : vector<8x128xf32> to vector<8x32xf32>
    %299 = arith.mulf %295, %298 : vector<8x32xf32>
    %300 = arith.addf %297, %299 : vector<8x32xf32>
    %301 = math.tanh %300 : vector<8x32xf32>
    %cst_53 = arith.constant 1.000000e+00 : f32
    %302 = vector.broadcast %cst_53 : f32 to vector<8x32xf32>
    %303 = arith.subf %302, %296 : vector<8x32xf32>
    %304 = arith.mulf %303, %301 : vector<8x32xf32>
    %305 = arith.mulf %296, %279 : vector<8x32xf32>
    %306 = arith.addf %304, %305 : vector<8x32xf32>
    %307 = vector.shape_cast %32 : vector<8x1xi1> to vector<8x1xi1>
    %308 = vector.broadcast %307 : vector<8x1xi1> to vector<8x32xi1>
    %309 = arith.select %308, %306, %279 : vector<8x32xi1>, vector<8x32xf32>
    %cst_54 = arith.constant 0.000000e+00 : f32
    %310 = vector.shape_cast %32 : vector<8x1xi1> to vector<8x1xi1>
    %311 = vector.broadcast %310 : vector<8x1xi1> to vector<8x32xi1>
    %312 = vector.broadcast %cst_54 : f32 to vector<8x32xf32>
    %313 = arith.select %311, %306, %312 : vector<8x32xi1>, vector<8x32xf32>
    %314 = vector.extract_strided_slice %12 {offsets = [16, 0], sizes = [8, 128], strides = [1, 1]} : vector<64x128xf32> to vector<8x128xf32>
    %315 = tpu.concatenate %309, %4 in 1 : vector<8x32xf32>, vector<8x1xf32> -> vector<8x33xf32>
    %cst_55 = arith.constant dense<0.000000e+00> : vector<8x128xf32>
    %316 = tpu.matmul %315, %3, %cst_55 {dimension_numbers = #tpu.dot_dimension_numbers<[1], [0], [0], [1], [0, 0, 1, 1], [], []>} : vector<8x33xf32>, vector<33x128xf32>, vector<8x128xf32> -> vector<8x128xf32>
    %317 = vector.extract_strided_slice %314 {offsets = [0, 0], sizes = [8, 64], strides = [1, 1]} : vector<8x128xf32> to vector<8x64xf32>
    %318 = vector.extract_strided_slice %316 {offsets = [0, 0], sizes = [8, 64], strides = [1, 1]} : vector<8x128xf32> to vector<8x64xf32>
    %319 = arith.addf %317, %318 : vector<8x64xf32>
    %320 = arith.negf %319 : vector<8x64xf32>
    %321 = math.exp %320 : vector<8x64xf32>
    %cst_56 = arith.constant 1.000000e+00 : f32
    %322 = vector.broadcast %cst_56 : f32 to vector<8x64xf32>
    %323 = arith.addf %322, %321 : vector<8x64xf32>
    %324 = arith.divf %322, %323 : vector<8x64xf32>
    %325 = vector.extract_strided_slice %324 {offsets = [0, 0], sizes = [8, 32], strides = [1, 1]} : vector<8x64xf32> to vector<8x32xf32>
    %326 = vector.extract_strided_slice %324 {offsets = [0, 32], sizes = [8, 32], strides = [1, 1]} : vector<8x64xf32> to vector<8x32xf32>
    %327 = vector.extract_strided_slice %314 {offsets = [0, 64], sizes = [8, 32], strides = [1, 1]} : vector<8x128xf32> to vector<8x32xf32>
    %328 = vector.extract_strided_slice %316 {offsets = [0, 64], sizes = [8, 32], strides = [1, 1]} : vector<8x128xf32> to vector<8x32xf32>
    %329 = arith.mulf %325, %328 : vector<8x32xf32>
    %330 = arith.addf %327, %329 : vector<8x32xf32>
    %331 = math.tanh %330 : vector<8x32xf32>
    %cst_57 = arith.constant 1.000000e+00 : f32
    %332 = vector.broadcast %cst_57 : f32 to vector<8x32xf32>
    %333 = arith.subf %332, %326 : vector<8x32xf32>
    %334 = arith.mulf %333, %331 : vector<8x32xf32>
    %335 = arith.mulf %326, %309 : vector<8x32xf32>
    %336 = arith.addf %334, %335 : vector<8x32xf32>
    %337 = vector.shape_cast %34 : vector<8x1xi1> to vector<8x1xi1>
    %338 = vector.broadcast %337 : vector<8x1xi1> to vector<8x32xi1>
    %339 = arith.select %338, %336, %309 : vector<8x32xi1>, vector<8x32xf32>
    %cst_58 = arith.constant 0.000000e+00 : f32
    %340 = vector.shape_cast %34 : vector<8x1xi1> to vector<8x1xi1>
    %341 = vector.broadcast %340 : vector<8x1xi1> to vector<8x32xi1>
    %342 = vector.broadcast %cst_58 : f32 to vector<8x32xf32>
    %343 = arith.select %341, %336, %342 : vector<8x32xi1>, vector<8x32xf32>
    %344 = vector.extract_strided_slice %12 {offsets = [24, 0], sizes = [8, 128], strides = [1, 1]} : vector<64x128xf32> to vector<8x128xf32>
    %345 = tpu.concatenate %339, %4 in 1 : vector<8x32xf32>, vector<8x1xf32> -> vector<8x33xf32>
    %cst_59 = arith.constant dense<0.000000e+00> : vector<8x128xf32>
    %346 = tpu.matmul %345, %3, %cst_59 {dimension_numbers = #tpu.dot_dimension_numbers<[1], [0], [0], [1], [0, 0, 1, 1], [], []>} : vector<8x33xf32>, vector<33x128xf32>, vector<8x128xf32> -> vector<8x128xf32>
    %347 = vector.extract_strided_slice %344 {offsets = [0, 0], sizes = [8, 64], strides = [1, 1]} : vector<8x128xf32> to vector<8x64xf32>
    %348 = vector.extract_strided_slice %346 {offsets = [0, 0], sizes = [8, 64], strides = [1, 1]} : vector<8x128xf32> to vector<8x64xf32>
    %349 = arith.addf %347, %348 : vector<8x64xf32>
    %350 = arith.negf %349 : vector<8x64xf32>
    %351 = math.exp %350 : vector<8x64xf32>
    %cst_60 = arith.constant 1.000000e+00 : f32
    %352 = vector.broadcast %cst_60 : f32 to vector<8x64xf32>
    %353 = arith.addf %352, %351 : vector<8x64xf32>
    %354 = arith.divf %352, %353 : vector<8x64xf32>
    %355 = vector.extract_strided_slice %354 {offsets = [0, 0], sizes = [8, 32], strides = [1, 1]} : vector<8x64xf32> to vector<8x32xf32>
    %356 = vector.extract_strided_slice %354 {offsets = [0, 32], sizes = [8, 32], strides = [1, 1]} : vector<8x64xf32> to vector<8x32xf32>
    %357 = vector.extract_strided_slice %344 {offsets = [0, 64], sizes = [8, 32], strides = [1, 1]} : vector<8x128xf32> to vector<8x32xf32>
    %358 = vector.extract_strided_slice %346 {offsets = [0, 64], sizes = [8, 32], strides = [1, 1]} : vector<8x128xf32> to vector<8x32xf32>
    %359 = arith.mulf %355, %358 : vector<8x32xf32>
    %360 = arith.addf %357, %359 : vector<8x32xf32>
    %361 = math.tanh %360 : vector<8x32xf32>
    %cst_61 = arith.constant 1.000000e+00 : f32
    %362 = vector.broadcast %cst_61 : f32 to vector<8x32xf32>
    %363 = arith.subf %362, %356 : vector<8x32xf32>
    %364 = arith.mulf %363, %361 : vector<8x32xf32>
    %365 = arith.mulf %356, %339 : vector<8x32xf32>
    %366 = arith.addf %364, %365 : vector<8x32xf32>
    %367 = vector.shape_cast %36 : vector<8x1xi1> to vector<8x1xi1>
    %368 = vector.broadcast %367 : vector<8x1xi1> to vector<8x32xi1>
    %369 = arith.select %368, %366, %339 : vector<8x32xi1>, vector<8x32xf32>
    %cst_62 = arith.constant 0.000000e+00 : f32
    %370 = vector.shape_cast %36 : vector<8x1xi1> to vector<8x1xi1>
    %371 = vector.broadcast %370 : vector<8x1xi1> to vector<8x32xi1>
    %372 = vector.broadcast %cst_62 : f32 to vector<8x32xf32>
    %373 = arith.select %371, %366, %372 : vector<8x32xi1>, vector<8x32xf32>
    %374 = vector.extract_strided_slice %12 {offsets = [32, 0], sizes = [8, 128], strides = [1, 1]} : vector<64x128xf32> to vector<8x128xf32>
    %375 = tpu.concatenate %369, %4 in 1 : vector<8x32xf32>, vector<8x1xf32> -> vector<8x33xf32>
    %cst_63 = arith.constant dense<0.000000e+00> : vector<8x128xf32>
    %376 = tpu.matmul %375, %3, %cst_63 {dimension_numbers = #tpu.dot_dimension_numbers<[1], [0], [0], [1], [0, 0, 1, 1], [], []>} : vector<8x33xf32>, vector<33x128xf32>, vector<8x128xf32> -> vector<8x128xf32>
    %377 = vector.extract_strided_slice %374 {offsets = [0, 0], sizes = [8, 64], strides = [1, 1]} : vector<8x128xf32> to vector<8x64xf32>
    %378 = vector.extract_strided_slice %376 {offsets = [0, 0], sizes = [8, 64], strides = [1, 1]} : vector<8x128xf32> to vector<8x64xf32>
    %379 = arith.addf %377, %378 : vector<8x64xf32>
    %380 = arith.negf %379 : vector<8x64xf32>
    %381 = math.exp %380 : vector<8x64xf32>
    %cst_64 = arith.constant 1.000000e+00 : f32
    %382 = vector.broadcast %cst_64 : f32 to vector<8x64xf32>
    %383 = arith.addf %382, %381 : vector<8x64xf32>
    %384 = arith.divf %382, %383 : vector<8x64xf32>
    %385 = vector.extract_strided_slice %384 {offsets = [0, 0], sizes = [8, 32], strides = [1, 1]} : vector<8x64xf32> to vector<8x32xf32>
    %386 = vector.extract_strided_slice %384 {offsets = [0, 32], sizes = [8, 32], strides = [1, 1]} : vector<8x64xf32> to vector<8x32xf32>
    %387 = vector.extract_strided_slice %374 {offsets = [0, 64], sizes = [8, 32], strides = [1, 1]} : vector<8x128xf32> to vector<8x32xf32>
    %388 = vector.extract_strided_slice %376 {offsets = [0, 64], sizes = [8, 32], strides = [1, 1]} : vector<8x128xf32> to vector<8x32xf32>
    %389 = arith.mulf %385, %388 : vector<8x32xf32>
    %390 = arith.addf %387, %389 : vector<8x32xf32>
    %391 = math.tanh %390 : vector<8x32xf32>
    %cst_65 = arith.constant 1.000000e+00 : f32
    %392 = vector.broadcast %cst_65 : f32 to vector<8x32xf32>
    %393 = arith.subf %392, %386 : vector<8x32xf32>
    %394 = arith.mulf %393, %391 : vector<8x32xf32>
    %395 = arith.mulf %386, %369 : vector<8x32xf32>
    %396 = arith.addf %394, %395 : vector<8x32xf32>
    %397 = vector.shape_cast %38 : vector<8x1xi1> to vector<8x1xi1>
    %398 = vector.broadcast %397 : vector<8x1xi1> to vector<8x32xi1>
    %399 = arith.select %398, %396, %369 : vector<8x32xi1>, vector<8x32xf32>
    %cst_66 = arith.constant 0.000000e+00 : f32
    %400 = vector.shape_cast %38 : vector<8x1xi1> to vector<8x1xi1>
    %401 = vector.broadcast %400 : vector<8x1xi1> to vector<8x32xi1>
    %402 = vector.broadcast %cst_66 : f32 to vector<8x32xf32>
    %403 = arith.select %401, %396, %402 : vector<8x32xi1>, vector<8x32xf32>
    %404 = vector.extract_strided_slice %12 {offsets = [40, 0], sizes = [8, 128], strides = [1, 1]} : vector<64x128xf32> to vector<8x128xf32>
    %405 = tpu.concatenate %399, %4 in 1 : vector<8x32xf32>, vector<8x1xf32> -> vector<8x33xf32>
    %cst_67 = arith.constant dense<0.000000e+00> : vector<8x128xf32>
    %406 = tpu.matmul %405, %3, %cst_67 {dimension_numbers = #tpu.dot_dimension_numbers<[1], [0], [0], [1], [0, 0, 1, 1], [], []>} : vector<8x33xf32>, vector<33x128xf32>, vector<8x128xf32> -> vector<8x128xf32>
    %407 = vector.extract_strided_slice %404 {offsets = [0, 0], sizes = [8, 64], strides = [1, 1]} : vector<8x128xf32> to vector<8x64xf32>
    %408 = vector.extract_strided_slice %406 {offsets = [0, 0], sizes = [8, 64], strides = [1, 1]} : vector<8x128xf32> to vector<8x64xf32>
    %409 = arith.addf %407, %408 : vector<8x64xf32>
    %410 = arith.negf %409 : vector<8x64xf32>
    %411 = math.exp %410 : vector<8x64xf32>
    %cst_68 = arith.constant 1.000000e+00 : f32
    %412 = vector.broadcast %cst_68 : f32 to vector<8x64xf32>
    %413 = arith.addf %412, %411 : vector<8x64xf32>
    %414 = arith.divf %412, %413 : vector<8x64xf32>
    %415 = vector.extract_strided_slice %414 {offsets = [0, 0], sizes = [8, 32], strides = [1, 1]} : vector<8x64xf32> to vector<8x32xf32>
    %416 = vector.extract_strided_slice %414 {offsets = [0, 32], sizes = [8, 32], strides = [1, 1]} : vector<8x64xf32> to vector<8x32xf32>
    %417 = vector.extract_strided_slice %404 {offsets = [0, 64], sizes = [8, 32], strides = [1, 1]} : vector<8x128xf32> to vector<8x32xf32>
    %418 = vector.extract_strided_slice %406 {offsets = [0, 64], sizes = [8, 32], strides = [1, 1]} : vector<8x128xf32> to vector<8x32xf32>
    %419 = arith.mulf %415, %418 : vector<8x32xf32>
    %420 = arith.addf %417, %419 : vector<8x32xf32>
    %421 = math.tanh %420 : vector<8x32xf32>
    %cst_69 = arith.constant 1.000000e+00 : f32
    %422 = vector.broadcast %cst_69 : f32 to vector<8x32xf32>
    %423 = arith.subf %422, %416 : vector<8x32xf32>
    %424 = arith.mulf %423, %421 : vector<8x32xf32>
    %425 = arith.mulf %416, %399 : vector<8x32xf32>
    %426 = arith.addf %424, %425 : vector<8x32xf32>
    %427 = vector.shape_cast %40 : vector<8x1xi1> to vector<8x1xi1>
    %428 = vector.broadcast %427 : vector<8x1xi1> to vector<8x32xi1>
    %429 = arith.select %428, %426, %399 : vector<8x32xi1>, vector<8x32xf32>
    %cst_70 = arith.constant 0.000000e+00 : f32
    %430 = vector.shape_cast %40 : vector<8x1xi1> to vector<8x1xi1>
    %431 = vector.broadcast %430 : vector<8x1xi1> to vector<8x32xi1>
    %432 = vector.broadcast %cst_70 : f32 to vector<8x32xf32>
    %433 = arith.select %431, %426, %432 : vector<8x32xi1>, vector<8x32xf32>
    %434 = vector.extract_strided_slice %12 {offsets = [48, 0], sizes = [8, 128], strides = [1, 1]} : vector<64x128xf32> to vector<8x128xf32>
    %435 = tpu.concatenate %429, %4 in 1 : vector<8x32xf32>, vector<8x1xf32> -> vector<8x33xf32>
    %cst_71 = arith.constant dense<0.000000e+00> : vector<8x128xf32>
    %436 = tpu.matmul %435, %3, %cst_71 {dimension_numbers = #tpu.dot_dimension_numbers<[1], [0], [0], [1], [0, 0, 1, 1], [], []>} : vector<8x33xf32>, vector<33x128xf32>, vector<8x128xf32> -> vector<8x128xf32>
    %437 = vector.extract_strided_slice %434 {offsets = [0, 0], sizes = [8, 64], strides = [1, 1]} : vector<8x128xf32> to vector<8x64xf32>
    %438 = vector.extract_strided_slice %436 {offsets = [0, 0], sizes = [8, 64], strides = [1, 1]} : vector<8x128xf32> to vector<8x64xf32>
    %439 = arith.addf %437, %438 : vector<8x64xf32>
    %440 = arith.negf %439 : vector<8x64xf32>
    %441 = math.exp %440 : vector<8x64xf32>
    %cst_72 = arith.constant 1.000000e+00 : f32
    %442 = vector.broadcast %cst_72 : f32 to vector<8x64xf32>
    %443 = arith.addf %442, %441 : vector<8x64xf32>
    %444 = arith.divf %442, %443 : vector<8x64xf32>
    %445 = vector.extract_strided_slice %444 {offsets = [0, 0], sizes = [8, 32], strides = [1, 1]} : vector<8x64xf32> to vector<8x32xf32>
    %446 = vector.extract_strided_slice %444 {offsets = [0, 32], sizes = [8, 32], strides = [1, 1]} : vector<8x64xf32> to vector<8x32xf32>
    %447 = vector.extract_strided_slice %434 {offsets = [0, 64], sizes = [8, 32], strides = [1, 1]} : vector<8x128xf32> to vector<8x32xf32>
    %448 = vector.extract_strided_slice %436 {offsets = [0, 64], sizes = [8, 32], strides = [1, 1]} : vector<8x128xf32> to vector<8x32xf32>
    %449 = arith.mulf %445, %448 : vector<8x32xf32>
    %450 = arith.addf %447, %449 : vector<8x32xf32>
    %451 = math.tanh %450 : vector<8x32xf32>
    %cst_73 = arith.constant 1.000000e+00 : f32
    %452 = vector.broadcast %cst_73 : f32 to vector<8x32xf32>
    %453 = arith.subf %452, %446 : vector<8x32xf32>
    %454 = arith.mulf %453, %451 : vector<8x32xf32>
    %455 = arith.mulf %446, %429 : vector<8x32xf32>
    %456 = arith.addf %454, %455 : vector<8x32xf32>
    %457 = vector.shape_cast %42 : vector<8x1xi1> to vector<8x1xi1>
    %458 = vector.broadcast %457 : vector<8x1xi1> to vector<8x32xi1>
    %459 = arith.select %458, %456, %429 : vector<8x32xi1>, vector<8x32xf32>
    %cst_74 = arith.constant 0.000000e+00 : f32
    %460 = vector.shape_cast %42 : vector<8x1xi1> to vector<8x1xi1>
    %461 = vector.broadcast %460 : vector<8x1xi1> to vector<8x32xi1>
    %462 = vector.broadcast %cst_74 : f32 to vector<8x32xf32>
    %463 = arith.select %461, %456, %462 : vector<8x32xi1>, vector<8x32xf32>
    %464 = vector.extract_strided_slice %12 {offsets = [56, 0], sizes = [8, 128], strides = [1, 1]} : vector<64x128xf32> to vector<8x128xf32>
    %465 = tpu.concatenate %459, %4 in 1 : vector<8x32xf32>, vector<8x1xf32> -> vector<8x33xf32>
    %cst_75 = arith.constant dense<0.000000e+00> : vector<8x128xf32>
    %466 = tpu.matmul %465, %3, %cst_75 {dimension_numbers = #tpu.dot_dimension_numbers<[1], [0], [0], [1], [0, 0, 1, 1], [], []>} : vector<8x33xf32>, vector<33x128xf32>, vector<8x128xf32> -> vector<8x128xf32>
    %467 = vector.extract_strided_slice %464 {offsets = [0, 0], sizes = [8, 64], strides = [1, 1]} : vector<8x128xf32> to vector<8x64xf32>
    %468 = vector.extract_strided_slice %466 {offsets = [0, 0], sizes = [8, 64], strides = [1, 1]} : vector<8x128xf32> to vector<8x64xf32>
    %469 = arith.addf %467, %468 : vector<8x64xf32>
    %470 = arith.negf %469 : vector<8x64xf32>
    %471 = math.exp %470 : vector<8x64xf32>
    %cst_76 = arith.constant 1.000000e+00 : f32
    %472 = vector.broadcast %cst_76 : f32 to vector<8x64xf32>
    %473 = arith.addf %472, %471 : vector<8x64xf32>
    %474 = arith.divf %472, %473 : vector<8x64xf32>
    %475 = vector.extract_strided_slice %474 {offsets = [0, 0], sizes = [8, 32], strides = [1, 1]} : vector<8x64xf32> to vector<8x32xf32>
    %476 = vector.extract_strided_slice %474 {offsets = [0, 32], sizes = [8, 32], strides = [1, 1]} : vector<8x64xf32> to vector<8x32xf32>
    %477 = vector.extract_strided_slice %464 {offsets = [0, 64], sizes = [8, 32], strides = [1, 1]} : vector<8x128xf32> to vector<8x32xf32>
    %478 = vector.extract_strided_slice %466 {offsets = [0, 64], sizes = [8, 32], strides = [1, 1]} : vector<8x128xf32> to vector<8x32xf32>
    %479 = arith.mulf %475, %478 : vector<8x32xf32>
    %480 = arith.addf %477, %479 : vector<8x32xf32>
    %481 = math.tanh %480 : vector<8x32xf32>
    %cst_77 = arith.constant 1.000000e+00 : f32
    %482 = vector.broadcast %cst_77 : f32 to vector<8x32xf32>
    %483 = arith.subf %482, %476 : vector<8x32xf32>
    %484 = arith.mulf %483, %481 : vector<8x32xf32>
    %485 = arith.mulf %476, %459 : vector<8x32xf32>
    %486 = arith.addf %484, %485 : vector<8x32xf32>
    %487 = vector.shape_cast %44 : vector<8x1xi1> to vector<8x1xi1>
    %488 = vector.broadcast %487 : vector<8x1xi1> to vector<8x32xi1>
    %489 = arith.select %488, %486, %459 : vector<8x32xi1>, vector<8x32xf32>
    %cst_78 = arith.constant 0.000000e+00 : f32
    %490 = vector.shape_cast %44 : vector<8x1xi1> to vector<8x1xi1>
    %491 = vector.broadcast %490 : vector<8x1xi1> to vector<8x32xi1>
    %492 = vector.broadcast %cst_78 : f32 to vector<8x32xf32>
    %493 = arith.select %491, %486, %492 : vector<8x32xi1>, vector<8x32xf32>
    %494 = tpu.concatenate %283, %313, %343, %373, %403, %433, %463, %493 in 1 : vector<8x32xf32>, vector<8x32xf32>, vector<8x32xf32>, vector<8x32xf32>, vector<8x32xf32>, vector<8x32xf32>, vector<8x32xf32>, vector<8x32xf32> -> vector<8x256xf32>
    %c0_79 = arith.constant 0 : index
    %c0_80 = arith.constant 0 : index
    %495 = vector.load %arg7[%c0_79, %c0_80] : memref<8x256xf32, #tpu.memory_space<vmem>>, vector<8x256xf32>
    tpu.vector_store %arg7[%c0_79, %c0_80], %494 {strides = array<i32>} : memref<8x256xf32, #tpu.memory_space<vmem>>, vector<8x256xf32>,
    %c0_81 = arith.constant 0 : index
    %c0_82 = arith.constant 0 : index
    %496 = vector.load %arg8[%c0_81, %c0_82] : memref<8x32xf32, #tpu.memory_space<vmem>>, vector<8x32xf32>
    tpu.vector_store %arg8[%c0_81, %c0_82], %489 {strides = array<i32>} : memref<8x32xf32, #tpu.memory_space<vmem>>, vector<8x32xf32>,
    return
  }
}

</mosaic_0001>

<bundles_post_ra>
// kernel: session_capturer_forward.1
= control target key start
LH: loop header
LB: loop body
LE: loop exit
PB: predicated region body
PF: predicated region fallthrough
CT: control target
= control target key end

     0   :  { %v2602_v0 = vmov 0.0|0.0   ;;  %v2603_v2 = vmov 0   ;;  %vm2604_vm0 = vmmov 0   ;;  %v2605_v6 = vmov 0.0   ;;  %s2607_s25 = smov 64   ;;  %s3123_s3 = inlined_call_operand.vmem [shape: bf16[32,256], index: 3, kind: input, shape index: {}]   ;;  %s3124_s5 = inlined_call_operand.vmem [shape: f32[33,128], index: 5, kind: input, shape index: {}]   ;;  %s3125_s0 = inlined_call_operand.vmem [shape: bf16[64,32], index: 0, kind: input, shape index: {}]   ;;  %s3126_s1 = inlined_call_operand.vmem [shape: s32[8,1], index: 1, kind: input, shape index: {}]   ;;  %s3127_s4 = inlined_call_operand.vmem [shape: f32[1,256], index: 4, kind: input, shape index: {}]   ;;  %s3128_s6 = inlined_call_operand.vmem [shape: f32[33,128], index: 6, kind: input, shape index: {}]   ;;  %s3129_s2 = inlined_call_operand.vmem [shape: s32[8,1], index: 2, kind: input, shape index: {}]   ;;  %s3130_s7 = inlined_call_operand.vmem [shape: f32[8,256], index: 7, kind: output, shape index: {0}]   ;;  %s3131_s8 = inlined_call_operand.vmem [shape: f32[8,32], index: 8, kind: output, shape index: {1}]  }
   0x1   :  { %2390 = vmatprep.subr.bf16.mxu1 %v2602_v0  ;;  %v2496_v1 = vld [vmem:[%s3123_s3 + $0x4] ss:$8 sps:$4 sm:$0xff]   ;;  %150 = vmatprep.mubr.bf16.mxu0 %v2603_v2  ;;  %v2498_v5 = vld [vmem:[%s3123_s3] ss:$8 sps:$4 sm:$0xff]   ;;  %v2499_v8 = vld [vmem:[%s3123_s3 + $0x14] ss:$8 sps:$4 sm:$0xff]   ;;  %v55_v25 = vlaneseq }
   0x2   :  { %v31_v3 = vld [vmem:[%s3124_s5] sm:$0xff]  ;;  %v32_v4 = vld [vmem:[%s3124_s5 + $0x8] sm:$0xff]  ;;  %2192 = vmatprep.mubr.msk.f32.mxu1 %vm2604_vm0, %v2605_v6  ;;  %2494 = vset.pattern.permute.xlu1 %v2603_v2  ;;  %v33_v9 = vld [vmem:[%s3124_s5 + $0x10] sm:$0xff]  ;;  %vm105_vm1 = vcmask 261120   ;;  %vm212_vm2 = vcmask 1040384   ;;  %v2606_v15 = vmov 1.0  }
   0x3   :  { %118 = vmatprep.subr.bf16.mxu0 %v2496_v1  ;;  %v2672_v7 = vpack.c.bf16 %v32_v4, %v31_v3  ;;  %2495 = vset.pattern.permute.xlu0 %v2603_v2  ;;  %v34_v10 = vld [vmem:[%s3124_s5 + $0x18] sm:$0xff]  ;;  %v2502_v13 = vld [vmem:[%s3125_s0] sm:$0xff]   ;;  %v207_v16 = vsel %vm105_vm1, 0.0, %v2606_v15  ;;  %vm208_vm3 = vcmask 269312   ;;  %v2737_v26 = vshrl.u32 %v55_v25, 7  ;;  %v2503_v63 = vld [vmem:[%s3125_s0 + $0x8] sm:$0xff]  }
   0x4   :  { %119 = vmatpush1.bf16.msra.mxu0 %v2498_v5  ;;  %v2501_v11 = vld [vmem:[%s3123_s3 + $0x10] ss:$8 sps:$4 sm:$0xff]   ;;  %v2688_v12 = vpack.c.bf16 %v34_v10, %v33_v9  ;;  %v2700_v14 = vld [vmem:[%s3124_s5 + $0x20] sm:$0x1] }
   0x5   :  { %2392 = vmatpush3.bf16.msra.mxu1 %v2672_v7  ;;  %120 = vmatprep.subr.bf16.mxu0 %v2499_v8  ;;  %v2728_v17 = vld [vmem:[%s3126_s1] sm:$0xff]  ;;  %v57_v27 = vsub.s32 0, %v2737_v26 }
   0x6   :  { %2393 = vmatprep.subr.bf16.mxu1 %v2602_v0  ;;  %vm191_vm4 = vcmp.gt.s32.totalorder %v2728_v17, 0  ;;  %v2743_v28 = vld [vmem:[%s3127_s4] sm:$0x3]  ;;  %s2608_s4 = smov 96   ;;  %vm192_vm6 = vcmp.gt.s32.totalorder %v2728_v17, 1  ;;  %vm193_vm8 = vcmp.gt.s32.totalorder %v2728_v17, 2 }
   0x7   :  { %v312_v18 = vsel %vm191_vm4, 1, %v2603_v2  ;;  %v2746_v29 = vrot.slane %v2743_v28, %v57_v27  ;;  %v422_v52 = vsel %vm192_vm6, 1, %v2603_v2  ;;  %vm194_vm10 = vcmp.gt.s32.totalorder %v2728_v17, 3 }
   0x8   :  { %121 = vmatpush1.bf16.msra.mxu0 %v2501_v11  ;;  %314 = vperm.xlu1 %2494, %v312_v18   ;;  %vm195_vm12 = vcmp.gt.s32.totalorder %v2728_v17, 4  ;;  %vm196_vm14 = vcmp.gt.s32.totalorder %v2728_v17, 5  ;;  %vm197_vm4 = vcmp.gt.s32.totalorder %v2728_v17, 6  ;;  %vm198_vm6 = vcmp.gt.s32.totalorder %v2728_v17, 7 }
   0x9   :  { %2395 = vmatpush3.bf16.msra.mxu1 %v2688_v12  ;;  %2408 = vmatprep.subr.bf16.mxu0 %v2602_v0 }
   0xa   :  { %2190 = vmatprep.subr.mxu1 %v2605_v6 }
   0xb   :  { %2034 = vmatmul.mubr.msk.bf16.vlgmr.msra.gmra.mrb[0].mxu0 %vm105_vm1, %v2502_v13 }
   0xc   :  { %160 = vmatprep.mubr.bf16.mxu0 %v2603_v2  ;;  %2410 = vmatpush3.bf16.msra.mxu0 %v2672_v7 }
   0xd   :  { %2191 = vmatpush3.msk.msra.mxu1 %vm212_vm2, %v2700_v14  ;;  %2411 = vmatprep.subr.bf16.mxu0 %v2602_v0 }
   0xe   :  { %2193 = vmatmul.mubr.msk.f32.vlgmr.msra.gmra.mrb[0].mxu1 %vm208_vm3, %v207_v16  ;;  %2396 = vmatprep.subr.bf16.mxu1 %v2602_v0 }
   0xf   :  { %2398 = vmatpush3.bf16.msra.mxu1 %v2672_v7  ;;  %2205 = vmatprep.mubr.msk.f32.mxu1 %vm2604_vm0, %v2605_v6 }
  0x10   :  { %2399 = vmatprep.subr.bf16.mxu1 %v2602_v0  ;;  %2413 = vmatpush3.bf16.msra.mxu0 %v2688_v12 }
  0x11   :  { %2229 = vmatprep.subr.mxu0 %v2605_v6 }
  0x13   :  { %2401 = vmatpush3.bf16.msra.mxu1 %v2688_v12  ;;  %2035 = vmatmul.mubr.msk.bf16.gmra.mrb[4].mxu0 %vm105_vm1, %v2503_v63 }
  0x14   :  { %2203 = vmatprep.subr.mxu1 %v2605_v6  ;;  %2230 = vmatpush3.msk.msra.mxu0 %vm212_vm2, %v2700_v14 }
  0x15   :  { %2420 = vmatprep.subr.bf16.mxu0 %v2602_v0  ;;  %170 = vmatprep.mubr.bf16.mxu0 %v2603_v2 }
  0x17   :  { %2204 = vmatpush3.msk.msra.mxu1 %vm212_vm2, %v2700_v14 }
  0x18   :  { %2402 = vmatprep.subr.bf16.mxu1 %v2602_v0 }
  0x87   :  { %v315_v41 = vpop.permute.xlu1 %314 }
  0x88   :  { %vm316_vm5 = vcmp.eq.s32.totalorder %v315_v41, 1 }
  0xde   :  { %v152_v19 = vpop.f32.mrb[0].mxu0 }
  0xdf   :  { %v2732_v20 = vpop.f32.mrb[1].mxu0  ;;  %v153_v30 = vadd.f32 %v152_v19, %v2746_v29 }
  0xe0   :  { %v156_v21 = vpop.f32.mrb[2].mxu0 }
  0xe1   :  { %v282_v22 = vpop.f32.mrb[0].mxu1  ;;  %v2734_v23 = vpop.f32.mrb[3].mxu0  ;;  %v157_v53 = vadd.f32 %v156_v21, %v2746_v29 }
  0xe2   :  { %294 = vrot.lane.b32.xlu0 %v282_v22, %s2607_s25  ;;  %v2194_v24 = vpop.f32.mrb[1].mxu1  ;;  %v286_v31 = vadd.f32 %v282_v22, %v153_v30 }
  0xe4   :  { %v2040_v32 = vmul.f32 -1.442695, %v286_v31 }
  0xe6   :  { %2506 = vpow2.f32 %v2040_v32  ;;  %v162_v13 = vpop.f32.mrb[4].mxu0 }
  0xe7   :  { %v2786_v18 = vpop.f32.mrb[5].mxu0  ;;  %v163_v25 = vadd.f32 %v162_v13, %v2746_v29 }
  0xe8   :  { %v2788_v19 = vpop.f32.mrb[6].mxu0 }
  0xe9   :  { %v2790_v21 = vpop.f32.mrb[7].mxu0 }
  0xf0   :  { %v2507_v33 = vpop.eup %2506 }
  0xf1   :  { %v290_v34 = vadd.f32 1.0, %v2507_v33  ;;  %v532_v33 = vsel %vm193_vm8, 1, %v2603_v2 }
  0xf3   :  { %2508 = vrcp.f32 %v290_v34 }
  0xfd   :  { %v2509_v35 = vpop.eup %2508 }
  0xfe   :  { %v304_v42 = vsub.f32 1.0, %v2509_v35  ;;  %v310_v44 = vmul.f32 0.0, %v2509_v35 }
 0x154   :  { %v295_v36 = vpop.permute.xlu0 %294 }
 0x155   :  { %v297_v37 = vmul.f32 %v2509_v35, %v295_v36 }
 0x157   :  { %299 = vrot.lane.b32.xlu0 %v297_v37, %s2607_s25 }
 0x1c9   :  { %v300_v38 = vpop.permute.xlu0 %299 }
 0x1ca   :  { %v302_v39 = vadd.f32 %v300_v38, %v153_v30 }
 0x1cc   :  { %2510 = vtanh.f32 %v302_v39  ;;  %v2504_v39 = vld [vmem:[%s3125_s0 + $0x10] sm:$0xff]  }
 0x1cd   :  { %2036 = vmatmul.mubr.msk.bf16.gmra.mrb[8].mxu0 %vm105_vm1, %v2504_v39 }
 0x1ce   :  { %180 = vmatprep.mubr.bf16.mxu0 %v2603_v2 }
 0x1d6   :  { %v2511_v40 = vpop.eup %2510 }
 0x1d7   :  { %306 = vrot.lane.b32.xlu1 %v2511_v40, %s2608_s4  ;;  %v2505_v40 = vld [vmem:[%s3125_s0 + $0x18] sm:$0xff]  }
 0x1d8   :  { %2037 = vmatmul.mubr.msk.bf16.gmra.mrb[12].mxu0 %vm105_vm1, %v2505_v40 }
 0x1d9   :  { %2231 = vmatprep.mubr.msk.f32.mxu0 %vm2604_vm0, %v2605_v6 }
 0x249   :  { %v307_v43 = vpop.permute.xlu1 %306 }
 0x24a   :  { %v309_v45 = vmul.f32 %v307_v43, %v304_v42 }
 0x24c   :  { %v311_v46 = vadd.f32 %v310_v44, %v309_v45 }
 0x24e   :  { %v317_v47 = vsel %vm316_vm5, %v311_v46, 0.0 }
 0x24f   :  { %319 = vrot.lane.b32.xlu0 %v317_v47, %s2608_s4 }
 0x2c1   :  { %v320_v48 = vpop.permute.xlu0 %319 }
 0x2c2   :  { %v322_v49 = vsel %vm105_vm1, %v320_v48, 1.0 }
 0x2c3   :  { %2206 = vmatmul.mubr.msk.f32.vlgmr.msra.gmra.mrb[2].mxu1 %vm208_vm3, %v322_v49  ;;  %v2810_v49 = vpop.f32.mrb[8].mxu0 }
 0x2c4   :  { %2404 = vmatpush3.bf16.msra.mxu1 %v2672_v7  ;;  %2218 = vmatprep.mubr.msk.f32.mxu1 %vm2604_vm0, %v2605_v6 }
 0x2c5   :  { %2405 = vmatprep.subr.bf16.mxu1 %v2602_v0 }
 0x2c8   :  { %2407 = vmatpush3.bf16.msra.mxu1 %v2688_v12 }
 0x2c9   :  { %2216 = vmatprep.subr.mxu1 %v2605_v6 }
 0x2cc   :  { %2217 = vmatpush3.msk.msra.mxu1 %vm212_vm2, %v2700_v14 }
 0x2cd   :  { %2414 = vmatprep.subr.bf16.mxu1 %v2602_v0 }
 0x396   :  { %v392_v50 = vpop.f32.mrb[2].mxu1 }
 0x397   :  { %404 = vrot.lane.b32.xlu1 %v392_v50, %s2607_s25  ;;  %v2207_v51 = vpop.f32.mrb[3].mxu1  ;;  %v396_v54 = vadd.f32 %v392_v50, %v157_v53  ;;  %v2812_v50 = vpop.f32.mrb[9].mxu0 }
 0x398   :  { %v2814_v51 = vpop.f32.mrb[10].mxu0 }
 0x399   :  { %v2043_v55 = vmul.f32 -1.442695, %v396_v54 }
 0x39b   :  { %424 = vperm.xlu1 %2494, %v422_v52   ;;  %2512 = vpow2.f32 %v2043_v55  ;;  %v2816_v52 = vpop.f32.mrb[11].mxu0 }
 0x3a5   :  { %v2513_v56 = vpop.eup %2512 }
 0x3a6   :  { %v400_v57 = vadd.f32 1.0, %v2513_v56 }
 0x3a8   :  { %2514 = vrcp.f32 %v400_v57 }
 0x3b2   :  { %v2515_v58 = vpop.eup %2514 }
 0x3b3   :  { %v414_v3 = vsub.f32 1.0, %v2515_v58  ;;  %v420_v8 = vmul.f32 %v2515_v58, %v317_v47 }
 0x409   :  { %v405_v59 = vpop.permute.xlu1 %404 }
 0x40a   :  { %v407_v60 = vmul.f32 %v2515_v58, %v405_v59 }
 0x40c   :  { %409 = vrot.lane.b32.xlu0 %v407_v60, %s2607_s25 }
 0x41a   :  { %v425_v5 = vpop.permute.xlu1 %424 }
 0x41b   :  { %vm426_vm7 = vcmp.eq.s32.totalorder %v425_v5, 1 }
 0x47e   :  { %v410_v61 = vpop.permute.xlu0 %409 }
 0x47f   :  { %v412_v62 = vadd.f32 %v410_v61, %v157_v53  ;;  %v2818_v53 = vpop.f32.mrb[12].mxu0  ;;  %v642_v61 = vsel %vm194_vm10, 1, %v2603_v2 }
 0x480   :  { %v2820_v54 = vpop.f32.mrb[13].mxu0 }
 0x481   :  { %2516 = vtanh.f32 %v412_v62  ;;  %v2822_v55 = vpop.f32.mrb[14].mxu0  ;;  %v167_v62 = vadd.f32 %v2788_v19, %v2746_v29 }
 0x482   :  { %v2824_v56 = vpop.f32.mrb[15].mxu0 }
 0x48b   :  { %v2517_v1 = vpop.eup %2516 }
 0x48c   :  { %416 = vrot.lane.b32.xlu0 %v2517_v1, %s2608_s4 }
 0x4fe   :  { %v417_v4 = vpop.permute.xlu0 %416 }
 0x4ff   :  { %v419_v9 = vmul.f32 %v417_v4, %v414_v3 }
 0x501   :  { %v421_v10 = vadd.f32 %v420_v8, %v419_v9 }
 0x503   :  { %v427_v11 = vsel %vm426_vm7, %v421_v10, %v317_v47 }
 0x504   :  { %429 = vrot.lane.b32.xlu1 %v427_v11, %s2608_s4 }
 0x576   :  { %v430_v15 = vpop.permute.xlu1 %429 }
 0x577   :  { %v432_v16 = vsel %vm105_vm1, %v430_v15, 1.0 }
 0x578   :  { %2219 = vmatmul.mubr.msk.f32.vlgmr.msra.gmra.mrb[4].mxu1 %vm208_vm3, %v432_v16 }
 0x579   :  { %2416 = vmatpush3.bf16.msra.mxu1 %v2672_v7  ;;  %2244 = vmatprep.mubr.msk.f32.mxu1 %vm2604_vm0, %v2605_v6 }
 0x57a   :  { %2417 = vmatprep.subr.bf16.mxu1 %v2602_v0 }
 0x57d   :  { %2419 = vmatpush3.bf16.msra.mxu1 %v2688_v12 }
 0x57e   :  { %2242 = vmatprep.subr.mxu1 %v2605_v6 }
 0x581   :  { %2243 = vmatpush3.msk.msra.mxu1 %vm212_vm2, %v2700_v14 }
 0x582   :  { %2426 = vmatprep.subr.bf16.mxu1 %v2602_v0 }
 0x64b   :  { %v502_v22 = vpop.f32.mrb[4].mxu1 }
 0x64c   :  { %514 = vrot.lane.b32.xlu0 %v502_v22, %s2607_s25  ;;  %v2220_v24 = vpop.f32.mrb[5].mxu1  ;;  %v506_v27 = vadd.f32 %v502_v22, %v163_v25 }
 0x64e   :  { %v2046_v30 = vmul.f32 -1.442695, %v506_v27 }
 0x650   :  { %2518 = vpow2.f32 %v2046_v30  ;;  %534 = vperm.xlu0 %2495, %v532_v33  }
 0x65a   :  { %v2519_v31 = vpop.eup %2518 }
 0x65b   :  { %v510_v32 = vadd.f32 1.0, %v2519_v31 }
 0x65d   :  { %2520 = vrcp.f32 %v510_v32 }
 0x667   :  { %v2521_v34 = vpop.eup %2520 }
 0x668   :  { %v524_v42 = vsub.f32 1.0, %v2521_v34  ;;  %v530_v45 = vmul.f32 %v2521_v34, %v427_v11 }
 0x6be   :  { %v515_v35 = vpop.permute.xlu0 %514 }
 0x6bf   :  { %v517_v36 = vmul.f32 %v2521_v34, %v515_v35  ;;  %v752_v34 = vsel %vm195_vm12, 1, %v2603_v2  ;;  %v173_v35 = vadd.f32 %v2810_v49, %v2746_v29 }
 0x6c1   :  { %519 = vrot.lane.b32.xlu1 %v517_v36, %s2607_s25 }
 0x6cf   :  { %v535_v43 = vpop.permute.xlu0 %534 }
 0x6d0   :  { %vm536_vm9 = vcmp.eq.s32.totalorder %v535_v43, 1 }
 0x733   :  { %v520_v37 = vpop.permute.xlu1 %519 }
 0x734   :  { %v522_v38 = vadd.f32 %v520_v37, %v163_v25 }
 0x736   :  { %2522 = vtanh.f32 %v522_v38 }
 0x740   :  { %v2523_v41 = vpop.eup %2522 }
 0x741   :  { %526 = vrot.lane.b32.xlu1 %v2523_v41, %s2608_s4 }
 0x7b3   :  { %v527_v44 = vpop.permute.xlu1 %526 }
 0x7b4   :  { %v529_v46 = vmul.f32 %v527_v44, %v524_v42 }
 0x7b6   :  { %v531_v47 = vadd.f32 %v530_v45, %v529_v46 }
 0x7b8   :  { %v537_v48 = vsel %vm536_vm9, %v531_v47, %v427_v11 }
 0x7b9   :  { %539 = vrot.lane.b32.xlu1 %v537_v48, %s2608_s4 }
 0x82b   :  { %v540_v57 = vpop.permute.xlu1 %539 }
 0x82c   :  { %v542_v58 = vsel %vm105_vm1, %v540_v57, 1.0 }
 0x82d   :  { %2232 = vmatmul.mubr.msk.f32.vlgmr.msra.gmra.mrb[16].mxu0 %vm208_vm3, %v542_v58 }
 0x82e   :  { %2422 = vmatpush3.bf16.msra.mxu0 %v2672_v7  ;;  %2257 = vmatprep.mubr.msk.f32.mxu0 %vm2604_vm0, %v2605_v6 }
 0x82f   :  { %2423 = vmatprep.subr.bf16.mxu0 %v2602_v0 }
 0x832   :  { %2425 = vmatpush3.bf16.msra.mxu0 %v2688_v12 }
 0x833   :  { %2255 = vmatprep.subr.mxu0 %v2605_v6 }
 0x836   :  { %2256 = vmatpush3.msk.msra.mxu0 %vm212_vm2, %v2700_v14 }
 0x837   :  { %2432 = vmatprep.subr.bf16.mxu0 %v2602_v0 }
 0x900   :  { %v612_v59 = vpop.f32.mrb[16].mxu0 }
 0x901   :  { %624 = vrot.lane.b32.xlu0 %v612_v59, %s2607_s25  ;;  %v2233_v60 = vpop.f32.mrb[17].mxu0  ;;  %v616_v63 = vadd.f32 %v612_v59, %v167_v62 }
 0x903   :  { %v2049_v1 = vmul.f32 -1.442695, %v616_v63  ;;  %v862_v63 = vsel %vm196_vm14, 1, %v2603_v2 }
 0x905   :  { %644 = vperm.xlu0 %2495, %v642_v61   ;;  %2524 = vpow2.f32 %v2049_v1  ;;  %v177_v1 = vadd.f32 %v2814_v51, %v2746_v29 }
 0x90f   :  { %v2525_v3 = vpop.eup %2524 }
 0x910   :  { %v620_v4 = vadd.f32 1.0, %v2525_v3 }
 0x912   :  { %2526 = vrcp.f32 %v620_v4 }
 0x91c   :  { %v2527_v5 = vpop.eup %2526 }
 0x91d   :  { %v634_v15 = vsub.f32 1.0, %v2527_v5  ;;  %v640_v22 = vmul.f32 %v2527_v5, %v537_v48 }
 0x973   :  { %v625_v8 = vpop.permute.xlu0 %624 }
 0x974   :  { %v627_v9 = vmul.f32 %v2527_v5, %v625_v8 }
 0x976   :  { %629 = vrot.lane.b32.xlu1 %v627_v9, %s2607_s25 }
 0x984   :  { %v645_v19 = vpop.permute.xlu0 %644 }
 0x985   :  { %vm646_vm11 = vcmp.eq.s32.totalorder %v645_v19, 1 }
 0x9e8   :  { %v630_v10 = vpop.permute.xlu1 %629 }
 0x9e9   :  { %v632_v11 = vadd.f32 %v630_v10, %v167_v62 }
 0x9eb   :  { %2528 = vtanh.f32 %v632_v11 }
 0x9f5   :  { %v2529_v13 = vpop.eup %2528 }
 0x9f6   :  { %636 = vrot.lane.b32.xlu1 %v2529_v13, %s2608_s4 }
 0xa68   :  { %v637_v16 = vpop.permute.xlu1 %636 }
 0xa69   :  { %v639_v24 = vmul.f32 %v637_v16, %v634_v15 }
 0xa6b   :  { %v641_v25 = vadd.f32 %v640_v22, %v639_v24 }
 0xa6d   :  { %v647_v27 = vsel %vm646_vm11, %v641_v25, %v537_v48 }
 0xa6e   :  { %649 = vrot.lane.b32.xlu0 %v647_v27, %s2608_s4 }
 0xae0   :  { %v650_v30 = vpop.permute.xlu0 %649 }
 0xae1   :  { %v652_v31 = vsel %vm105_vm1, %v650_v30, 1.0 }
 0xae2   :  { %2245 = vmatmul.mubr.msk.f32.vlgmr.msra.gmra.mrb[6].mxu1 %vm208_vm3, %v652_v31 }
 0xae3   :  { %2428 = vmatpush3.bf16.msra.mxu1 %v2672_v7  ;;  %2270 = vmatprep.mubr.msk.f32.mxu1 %vm2604_vm0, %v2605_v6 }
 0xae4   :  { %2429 = vmatprep.subr.bf16.mxu1 %v2602_v0 }
 0xae7   :  { %2431 = vmatpush3.bf16.msra.mxu1 %v2688_v12 }
 0xae8   :  { %2268 = vmatprep.subr.mxu1 %v2605_v6 }
 0xaeb   :  { %2269 = vmatpush3.msk.msra.mxu1 %vm212_vm2, %v2700_v14 }
 0xaec   :  { %2438 = vmatprep.subr.bf16.mxu1 %v2602_v0 }
 0xbb5   :  { %v722_v32 = vpop.f32.mrb[6].mxu1 }
 0xbb6   :  { %734 = vrot.lane.b32.xlu1 %v722_v32, %s2607_s25  ;;  %v2246_v33 = vpop.f32.mrb[7].mxu1  ;;  %v726_v36 = vadd.f32 %v722_v32, %v173_v35 }
 0xbb7   :  { %v972_v33 = vsel %vm197_vm4, 1, %v2603_v2 }
 0xbb8   :  { %v2052_v37 = vmul.f32 -1.442695, %v726_v36 }
 0xbba   :  { %754 = vperm.xlu1 %2494, %v752_v34   ;;  %2530 = vpow2.f32 %v2052_v37  ;;  %v183_v34 = vadd.f32 %v2818_v53, %v2746_v29 }
 0xbc4   :  { %v2531_v38 = vpop.eup %2530 }
 0xbc5   :  { %v730_v39 = vadd.f32 1.0, %v2531_v38 }
 0xbc7   :  { %2532 = vrcp.f32 %v730_v39 }
 0xbd1   :  { %v2533_v40 = vpop.eup %2532 }
 0xbd2   :  { %v744_v46 = vsub.f32 1.0, %v2533_v40  ;;  %v750_v49 = vmul.f32 %v2533_v40, %v647_v27 }
 0xc28   :  { %v735_v41 = vpop.permute.xlu1 %734 }
 0xc29   :  { %v737_v42 = vmul.f32 %v2533_v40, %v735_v41 }
 0xc2b   :  { %739 = vrot.lane.b32.xlu0 %v737_v42, %s2607_s25 }
 0xc39   :  { %v755_v48 = vpop.permute.xlu1 %754 }
 0xc3a   :  { %vm756_vm13 = vcmp.eq.s32.totalorder %v755_v48, 1 }
 0xc9d   :  { %v740_v43 = vpop.permute.xlu0 %739 }
 0xc9e   :  { %v742_v44 = vadd.f32 %v740_v43, %v173_v35 }
 0xca0   :  { %2534 = vtanh.f32 %v742_v44 }
 0xcaa   :  { %v2535_v45 = vpop.eup %2534 }
 0xcab   :  { %746 = vrot.lane.b32.xlu0 %v2535_v45, %s2608_s4 }
 0xd1d   :  { %v747_v47 = vpop.permute.xlu0 %746 }
 0xd1e   :  { %v749_v57 = vmul.f32 %v747_v47, %v744_v46 }
 0xd20   :  { %v751_v58 = vadd.f32 %v750_v49, %v749_v57 }
 0xd22   :  { %v757_v59 = vsel %vm756_vm13, %v751_v58, %v647_v27 }
 0xd23   :  { %759 = vrot.lane.b32.xlu1 %v757_v59, %s2608_s4 }
 0xd95   :  { %v760_v60 = vpop.permute.xlu1 %759 }
 0xd96   :  { %v762_v61 = vsel %vm105_vm1, %v760_v60, 1.0 }
 0xd97   :  { %2258 = vmatmul.mubr.msk.f32.vlgmr.msra.gmra.mrb[18].mxu0 %vm208_vm3, %v762_v61 }
 0xd98   :  { %2434 = vmatpush3.bf16.msra.mxu0 %v2672_v7  ;;  %2283 = vmatprep.mubr.msk.f32.mxu0 %vm2604_vm0, %v2605_v6 }
 0xd99   :  { %2435 = vmatprep.subr.bf16.mxu0 %v2602_v0 }
 0xd9c   :  { %2437 = vmatpush3.bf16.msra.mxu0 %v2688_v12 }
 0xd9d   :  { %2281 = vmatprep.subr.mxu0 %v2605_v6 }
 0xda0   :  { %2282 = vmatpush3.msk.msra.mxu0 %vm212_vm2, %v2700_v14 }
 0xda1   :  { %2444 = vmatprep.subr.bf16.mxu0 %v2602_v0 }
 0xe6a   :  { %v832_v62 = vpop.f32.mrb[18].mxu0 }
 0xe6b   :  { %844 = vrot.lane.b32.xlu0 %v832_v62, %s2607_s25  ;;  %v2259_v7 = vpop.f32.mrb[19].mxu0  ;;  %v836_v12 = vadd.f32 %v832_v62, %v177_v1  ;;  %v1082_v62 = vsel %vm198_vm6, 1, %v2603_v2 }
 0xe6c   :  { %v187_v7 = vadd.f32 %v2822_v55, %v2746_v29  ;;  %v37_v29 = vld [vmem:[%s3128_s6 + $0x8] sm:$0xff]  ;;  %v38_v55 = vld [vmem:[%s3128_s6 + $0x10] sm:$0xff] }
 0xe6d   :  { %v2055_v3 = vmul.f32 -1.442695, %v836_v12 }
 0xe6f   :  { %864 = vperm.xlu0 %2495, %v862_v63   ;;  %2536 = vpow2.f32 %v2055_v3 }
 0xe79   :  { %v2537_v4 = vpop.eup %2536 }
 0xe7a   :  { %v840_v5 = vadd.f32 1.0, %v2537_v4 }
 0xe7c   :  { %2538 = vrcp.f32 %v840_v5 }
 0xe86   :  { %v2539_v14 = vpop.eup %2538 }
 0xe87   :  { %v854_v15 = vsub.f32 1.0, %v2539_v14  ;;  %v860_v19 = vmul.f32 %v2539_v14, %v757_v59 }
 0xedd   :  { %v845_v8 = vpop.permute.xlu0 %844 }
 0xede   :  { %v847_v9 = vmul.f32 %v2539_v14, %v845_v8 }
 0xee0   :  { %849 = vrot.lane.b32.xlu1 %v847_v9, %s2607_s25  ;;  %v36_v9 = vld [vmem:[%s3128_s6] sm:$0xff] }
 0xeee   :  { %v865_v51 = vpop.permute.xlu0 %864 }
 0xeef   :  { %vm866_vm15 = vcmp.eq.s32.totalorder %v865_v51, 1 }
 0xf52   :  { %v850_v10 = vpop.permute.xlu1 %849 }
 0xf53   :  { %v852_v11 = vadd.f32 %v850_v10, %v177_v1  ;;  %v2914_v10 = vpack.c.bf16 %v37_v29, %v36_v9 }
 0xf55   :  { %2540 = vtanh.f32 %v852_v11  ;;  %v39_v11 = vld [vmem:[%s3128_s6 + $0x18] sm:$0xff] }
 0xf5f   :  { %v2541_v13 = vpop.eup %2540 }
 0xf60   :  { %856 = vrot.lane.b32.xlu1 %v2541_v13, %s2608_s4  ;;  %v2920_v13 = vpack.c.bf16 %v39_v11, %v38_v55 }
 0xfd2   :  { %v857_v16 = vpop.permute.xlu1 %856 }
 0xfd3   :  { %v859_v22 = vmul.f32 %v857_v16, %v854_v15  ;;  %v2933_v16 = vld [vmem:[%s3128_s6 + $0x20] sm:$0x1] }
 0xfd5   :  { %v861_v24 = vadd.f32 %v860_v19, %v859_v22 }
 0xfd7   :  { %v867_v25 = vsel %vm866_vm15, %v861_v24, %v757_v59 }
 0xfd8   :  { %869 = vrot.lane.b32.xlu0 %v867_v25, %s2608_s4 }
0x104a   :  { %v870_v27 = vpop.permute.xlu0 %869 }
0x104b   :  { %v872_v30 = vsel %vm105_vm1, %v870_v27, 1.0 }
0x104c   :  { %2271 = vmatmul.mubr.msk.f32.vlgmr.msra.gmra.mrb[8].mxu1 %vm208_vm3, %v872_v30 }
0x104d   :  { %2296 = vmatprep.mubr.msk.f32.mxu1 %vm2604_vm0, %v2605_v6  ;;  %2440 = vmatpush3.bf16.msra.mxu1 %v2914_v10 }
0x104e   :  { %2441 = vmatprep.subr.bf16.mxu1 %v2602_v0 }
0x1051   :  { %2443 = vmatpush3.bf16.msra.mxu1 %v2920_v13 }
0x1052   :  { %2294 = vmatprep.subr.mxu1 %v2605_v6 }
0x1055   :  { %2295 = vmatpush3.msk.msra.mxu1 %vm212_vm2, %v2933_v16 }
0x1056   :  { %2450 = vmatprep.subr.bf16.mxu1 %v2602_v0 }
0x111f   :  { %v942_v31 = vpop.f32.mrb[8].mxu1 }
0x1120   :  { %954 = vrot.lane.b32.xlu1 %v942_v31, %s2607_s25  ;;  %v2272_v32 = vpop.f32.mrb[9].mxu1  ;;  %v946_v35 = vadd.f32 %v942_v31, %v183_v34 }
0x1122   :  { %v2058_v36 = vmul.f32 -1.442695, %v946_v35 }
0x1124   :  { %974 = vperm.xlu1 %2494, %v972_v33   ;;  %2542 = vpow2.f32 %v2058_v36  ;;  %v2956_v33 = vld [vmem:[%s3129_s2] sm:$0xff]  ;;  %s2609_s2 = smov 32  }
0x1125   :  { %vm199_vm8 = vcmp.gt.s32.totalorder %v2956_v33, 0  ;;  %vm200_vm10 = vcmp.gt.s32.totalorder %v2956_v33, 1  ;;  %vm201_vm12 = vcmp.gt.s32.totalorder %v2956_v33, 2  ;;  %vm202_vm14 = vcmp.gt.s32.totalorder %v2956_v33, 3 }
0x1126   :  { %v1195_v36 = vsel %vm199_vm8, 1, %v2603_v2  ;;  %vm203_vm4 = vcmp.gt.s32.totalorder %v2956_v33, 4  ;;  %vm204_vm6 = vcmp.gt.s32.totalorder %v2956_v33, 5  ;;  %vm206_vm8 = vcmp.gt.s32.totalorder %v2956_v33, 7 }
0x112e   :  { %v2543_v37 = vpop.eup %2542 }
0x112f   :  { %v950_v38 = vadd.f32 1.0, %v2543_v37  ;;  %v61_v37 = vsub.s32 1, %v2737_v26 }
0x1131   :  { %2544 = vrcp.f32 %v950_v38  ;;  %v2963_v38 = vrot.slane %v2743_v28, %v61_v37 }
0x113b   :  { %v2545_v39 = vpop.eup %2544 }
0x113c   :  { %v964_v45 = vsub.f32 1.0, %v2545_v39  ;;  %v970_v47 = vmul.f32 %v2545_v39, %v867_v25 }
0x1192   :  { %v955_v40 = vpop.permute.xlu1 %954 }
0x1193   :  { %v957_v41 = vmul.f32 %v2545_v39, %v955_v40  ;;  %v155_v39 = vadd.f32 %v2732_v20, %v2963_v38 }
0x1195   :  { %959 = vrot.lane.b32.xlu0 %v957_v41, %s2607_s25 }
0x11a3   :  { %v975_v53 = vpop.permute.xlu1 %974 }
0x11a4   :  { %vm976_vm5 = vcmp.eq.s32.totalorder %v975_v53, 1 }
0x1207   :  { %v960_v42 = vpop.permute.xlu0 %959 }
0x1208   :  { %v962_v43 = vadd.f32 %v960_v42, %v183_v34 }
0x120a   :  { %2546 = vtanh.f32 %v962_v43 }
0x1214   :  { %v2547_v44 = vpop.eup %2546 }
0x1215   :  { %966 = vrot.lane.b32.xlu0 %v2547_v44, %s2608_s4 }
0x1287   :  { %v967_v46 = vpop.permute.xlu0 %966 }
0x1288   :  { %v969_v48 = vmul.f32 %v967_v46, %v964_v45 }
0x128a   :  { %v971_v49 = vadd.f32 %v970_v47, %v969_v48 }
0x128c   :  { %v977_v57 = vsel %vm976_vm5, %v971_v49, %v867_v25 }
0x128d   :  { %979 = vrot.lane.b32.xlu1 %v977_v57, %s2608_s4 }
0x12ff   :  { %v980_v58 = vpop.permute.xlu1 %979 }
0x1300   :  { %v982_v59 = vsel %vm105_vm1, %v980_v58, 1.0 }
0x1301   :  { %2284 = vmatmul.mubr.msk.f32.vlgmr.msra.gmra.mrb[20].mxu0 %vm208_vm3, %v982_v59 }
0x1302   :  { %2309 = vmatprep.mubr.msk.f32.mxu0 %vm2604_vm0, %v2605_v6  ;;  %2446 = vmatpush3.bf16.msra.mxu0 %v2914_v10 }
0x1303   :  { %2447 = vmatprep.subr.bf16.mxu0 %v2602_v0 }
0x1306   :  { %2449 = vmatpush3.bf16.msra.mxu0 %v2920_v13 }
0x1307   :  { %2307 = vmatprep.subr.mxu0 %v2605_v6 }
0x130a   :  { %2308 = vmatpush3.msk.msra.mxu0 %vm212_vm2, %v2933_v16 }
0x130b   :  { %2456 = vmatprep.subr.bf16.mxu0 %v2602_v0 }
0x13d4   :  { %v1052_v60 = vpop.f32.mrb[20].mxu0 }
0x13d5   :  { %1064 = vrot.lane.b32.xlu0 %v1052_v60, %s2607_s25  ;;  %v2285_v61 = vpop.f32.mrb[21].mxu0  ;;  %v1056_v63 = vadd.f32 %v1052_v60, %v187_v7 }
0x13d7   :  { %v2061_v1 = vmul.f32 -1.442695, %v1056_v63 }
0x13d9   :  { %1084 = vperm.xlu0 %2495, %v1082_v62   ;;  %2548 = vpow2.f32 %v2061_v1  ;;  %v1306_v1 = vsel %vm200_vm10, 1, %v2603_v2 }
0x13e3   :  { %v2549_v12 = vpop.eup %2548 }
0x13e4   :  { %v1060_v3 = vadd.f32 1.0, %v2549_v12  ;;  %v159_v12 = vadd.f32 %v2734_v23, %v2963_v38 }
0x13e6   :  { %2550 = vrcp.f32 %v1060_v3 }
0x13f0   :  { %v2551_v4 = vpop.eup %2550 }
0x13f1   :  { %v1074_v51 = vsub.f32 1.0, %v2551_v4  ;;  %v1080_v24 = vmul.f32 %v2551_v4, %v977_v57 }
0x1447   :  { %v1065_v5 = vpop.permute.xlu0 %1064 }
0x1448   :  { %v1067_v14 = vmul.f32 %v2551_v4, %v1065_v5 }
0x144a   :  { %1069 = vrot.lane.b32.xlu1 %v1067_v14, %s2607_s25 }
0x1458   :  { %v1085_v22 = vpop.permute.xlu0 %1084 }
0x1459   :  { %vm1086_vm7 = vcmp.eq.s32.totalorder %v1085_v22, 1 }
0x14bc   :  { %v1070_v17 = vpop.permute.xlu1 %1069 }
0x14bd   :  { %v1072_v8 = vadd.f32 %v1070_v17, %v187_v7 }
0x14bf   :  { %2552 = vtanh.f32 %v1072_v8 }
0x14c9   :  { %v2553_v15 = vpop.eup %2552 }
0x14ca   :  { %1076 = vrot.lane.b32.xlu1 %v2553_v15, %s2608_s4 }
0x153c   :  { %v1077_v19 = vpop.permute.xlu1 %1076 }
0x153d   :  { %v1079_v25 = vmul.f32 %v1077_v19, %v1074_v51 }
0x153f   :  { %v1081_v27 = vadd.f32 %v1080_v24, %v1079_v25 }
0x1541   :  { %v1087_v30 = vsel %vm1086_vm7, %v1081_v27, %v977_v57 }
0x1542   :  { %1089 = vrot.lane.b32.xlu0 %v1087_v30, %s2608_s4 }
0x15b4   :  { %v1090_v31 = vpop.permute.xlu0 %1089 }
0x15b5   :  { %v1092_v32 = vsel %vm105_vm1, %v1090_v31, 1.0 }
0x15b6   :  { %2297 = vmatmul.mubr.msk.f32.vlgmr.msra.gmra.mrb[10].mxu1 %vm208_vm3, %v1092_v32 }
0x15b7   :  { %2452 = vmatpush3.bf16.msra.mxu1 %v2914_v10  ;;  %2322 = vmatprep.mubr.msk.f32.mxu1 %vm2604_vm0, %v2605_v6 }
0x15b8   :  { %2453 = vmatprep.subr.bf16.mxu1 %v2602_v0 }
0x15bb   :  { %2455 = vmatpush3.bf16.msra.mxu1 %v2920_v13 }
0x15bc   :  { %2320 = vmatprep.subr.mxu1 %v2605_v6 }
0x15bf   :  { %2321 = vmatpush3.msk.msra.mxu1 %vm212_vm2, %v2933_v16 }
0x15c0   :  { %2462 = vmatprep.subr.bf16.mxu1 %v2602_v0 }
0x1689   :  { %v1165_v34 = vpop.f32.mrb[10].mxu1 }
0x168a   :  { %1177 = vrot.lane.b32.xlu1 %v1165_v34, %s2607_s25  ;;  %v2298_v35 = vpop.f32.mrb[11].mxu1  ;;  %v1169_v40 = vadd.f32 %v1165_v34, %v155_v39 }
0x168b   :  { %v1417_v35 = vsel %vm201_vm12, 1, %v2603_v2 }
0x168c   :  { %v2064_v41 = vmul.f32 -1.442695, %v1169_v40 }
0x168e   :  { %1197 = vperm.xlu1 %2494, %v1195_v36   ;;  %2554 = vpow2.f32 %v2064_v41  ;;  %v165_v36 = vadd.f32 %v2786_v18, %v2963_v38 }
0x1698   :  { %v2555_v42 = vpop.eup %2554 }
0x1699   :  { %v1173_v43 = vadd.f32 1.0, %v2555_v42 }
0x169b   :  { %2556 = vrcp.f32 %v1173_v43 }
0x16a5   :  { %v2557_v44 = vpop.eup %2556 }
0x16a6   :  { %v1187_v28 = vsub.f32 1.0, %v2557_v44  ;;  %v1193_v49 = vmul.f32 %v2557_v44, %v1087_v30 }
0x16fc   :  { %v1178_v45 = vpop.permute.xlu1 %1177 }
0x16fd   :  { %v1180_v46 = vmul.f32 %v2557_v44, %v1178_v45 }
0x16ff   :  { %1182 = vrot.lane.b32.xlu0 %v1180_v46, %s2607_s25 }
0x170d   :  { %v1198_v20 = vpop.permute.xlu1 %1197 }
0x170e   :  { %vm1199_vm9 = vcmp.eq.s32.totalorder %v1198_v20, 1 }
0x1771   :  { %v1183_v53 = vpop.permute.xlu0 %1182 }
0x1772   :  { %v1185_v47 = vadd.f32 %v1183_v53, %v155_v39 }
0x1774   :  { %2558 = vtanh.f32 %v1185_v47 }
0x177e   :  { %v2559_v26 = vpop.eup %2558 }
0x177f   :  { %1189 = vrot.lane.b32.xlu0 %v2559_v26, %s2608_s4 }
0x17f1   :  { %v1190_v48 = vpop.permute.xlu0 %1189 }
0x17f2   :  { %v1192_v57 = vmul.f32 %v1190_v48, %v1187_v28 }
0x17f4   :  { %v1194_v58 = vadd.f32 %v1193_v49, %v1192_v57 }
0x17f6   :  { %v1200_v59 = vsel %vm1199_vm9, %v1194_v58, %v1087_v30  ;;  %v2969_v60 = vsel %vm1199_vm9, %v1194_v58, 0.0  ;;  %vm2006_vm9 = vcmask 785408  }
0x17f7   :  { %1203 = vrot.lane.b32.xlu1 %v1200_v59, %s2608_s4 }
0x1869   :  { %v1204_v61 = vpop.permute.xlu1 %1203 }
0x186a   :  { %v1206_v62 = vsel %vm105_vm1, %v1204_v61, 1.0 }
0x186b   :  { %2310 = vmatmul.mubr.msk.f32.vlgmr.msra.gmra.mrb[22].mxu0 %vm208_vm3, %v1206_v62 }
0x186c   :  { %2458 = vmatpush3.bf16.msra.mxu0 %v2914_v10  ;;  %2335 = vmatprep.mubr.msk.f32.mxu0 %vm2604_vm0, %v2605_v6 }
0x186d   :  { %2459 = vmatprep.subr.bf16.mxu0 %v2602_v0 }
0x1870   :  { %2461 = vmatpush3.bf16.msra.mxu0 %v2920_v13 }
0x1871   :  { %2333 = vmatprep.subr.mxu0 %v2605_v6 }
0x1874   :  { %2334 = vmatpush3.msk.msra.mxu0 %vm212_vm2, %v2933_v16 }
0x1875   :  { %2468 = vmatprep.subr.bf16.mxu0 %v2602_v0 }
0x193e   :  { %v1276_v7 = vpop.f32.mrb[22].mxu0 }
0x193f   :  { %1288 = vrot.lane.b32.xlu0 %v1276_v7, %s2607_s25  ;;  %v2311_v63 = vpop.f32.mrb[23].mxu0  ;;  %v1280_v3 = vadd.f32 %v1276_v7, %v159_v12  ;;  %v1528_v7 = vsel %vm202_vm14, 1, %v2603_v2 }
0x1940   :  { %v169_v63 = vadd.f32 %v2790_v21, %v2963_v38 }
0x1941   :  { %v2067_v4 = vmul.f32 -1.442695, %v1280_v3 }
0x1943   :  { %1308 = vperm.xlu0 %2495, %v1306_v1   ;;  %2560 = vpow2.f32 %v2067_v4 }
0x194d   :  { %v2561_v5 = vpop.eup %2560 }
0x194e   :  { %v1284_v14 = vadd.f32 1.0, %v2561_v5 }
0x1950   :  { %2562 = vrcp.f32 %v1284_v14 }
0x195a   :  { %v2563_v17 = vpop.eup %2562 }
0x195b   :  { %v1298_v15 = vsub.f32 1.0, %v2563_v17  ;;  %v1304_v19 = vmul.f32 %v2563_v17, %v1200_v59 }
0x19b1   :  { %v1289_v8 = vpop.permute.xlu0 %1288 }
0x19b2   :  { %v1291_v9 = vmul.f32 %v2563_v17, %v1289_v8 }
0x19b4   :  { %1293 = vrot.lane.b32.xlu1 %v1291_v9, %s2607_s25 }
0x19c2   :  { %v1309_v23 = vpop.permute.xlu0 %1308 }
0x19c3   :  { %vm1310_vm11 = vcmp.eq.s32.totalorder %v1309_v23, 1 }
0x1a26   :  { %v1294_v29 = vpop.permute.xlu1 %1293 }
0x1a27   :  { %v1296_v55 = vadd.f32 %v1294_v29, %v159_v12 }
0x1a29   :  { %2564 = vtanh.f32 %v1296_v55 }
0x1a33   :  { %v2565_v11 = vpop.eup %2564 }
0x1a34   :  { %1300 = vrot.lane.b32.xlu1 %v2565_v11, %s2608_s4 }
0x1aa6   :  { %v1301_v51 = vpop.permute.xlu1 %1300 }
0x1aa7   :  { %v1303_v22 = vmul.f32 %v1301_v51, %v1298_v15 }
0x1aa9   :  { %v1305_v24 = vadd.f32 %v1304_v19, %v1303_v22 }
0x1aab   :  { %v1311_v25 = vsel %vm1310_vm11, %v1305_v24, %v1200_v59  ;;  %v2990_v27 = vsel %vm1310_vm11, %v1305_v24, 0.0 }
0x1aac   :  { %1314 = vrot.lane.b32.xlu0 %v1311_v25, %s2608_s4 }
0x1b1e   :  { %v1315_v30 = vpop.permute.xlu0 %1314 }
0x1b1f   :  { %v1317_v31 = vsel %vm105_vm1, %v1315_v30, 1.0 }
0x1b20   :  { %2323 = vmatmul.mubr.msk.f32.vlgmr.msra.gmra.mrb[12].mxu1 %vm208_vm3, %v1317_v31 }
0x1b21   :  { %2464 = vmatpush3.bf16.msra.mxu1 %v2914_v10  ;;  %2348 = vmatprep.mubr.msk.f32.mxu1 %vm2604_vm0, %v2605_v6 }
0x1b22   :  { %2465 = vmatprep.subr.bf16.mxu1 %v2602_v0 }
0x1b25   :  { %2467 = vmatpush3.bf16.msra.mxu1 %v2920_v13 }
0x1b26   :  { %2346 = vmatprep.subr.mxu1 %v2605_v6 }
0x1b29   :  { %2347 = vmatpush3.msk.msra.mxu1 %vm212_vm2, %v2933_v16 }
0x1b2a   :  { %2474 = vmatprep.subr.bf16.mxu1 %v2602_v0 }
0x1bf3   :  { %v1387_v32 = vpop.f32.mrb[12].mxu1 }
0x1bf4   :  { %1399 = vrot.lane.b32.xlu1 %v1387_v32, %s2607_s25  ;;  %v2324_v34 = vpop.f32.mrb[13].mxu1  ;;  %v1391_v37 = vadd.f32 %v1387_v32, %v165_v36  ;;  %v1639_v32 = vsel %vm203_vm4, 1, %v2603_v2 }
0x1bf5   :  { %v175_v34 = vadd.f32 %v2812_v50, %v2963_v38 }
0x1bf6   :  { %v2070_v39 = vmul.f32 -1.442695, %v1391_v37 }
0x1bf8   :  { %1419 = vperm.xlu1 %2494, %v1417_v35   ;;  %2566 = vpow2.f32 %v2070_v39 }
0x1c02   :  { %v2567_v40 = vpop.eup %2566 }
0x1c03   :  { %v1395_v41 = vadd.f32 1.0, %v2567_v40 }
0x1c05   :  { %2568 = vrcp.f32 %v1395_v41 }
0x1c0f   :  { %v2569_v42 = vpop.eup %2568 }
0x1c10   :  { %v1409_v47 = vsub.f32 1.0, %v2569_v42  ;;  %v1415_v28 = vmul.f32 %v2569_v42, %v1311_v25 }
0x1c66   :  { %v1400_v43 = vpop.permute.xlu1 %1399 }
0x1c67   :  { %v1402_v44 = vmul.f32 %v2569_v42, %v1400_v43 }
0x1c69   :  { %1404 = vrot.lane.b32.xlu0 %v1402_v44, %s2607_s25 }
0x1c77   :  { %v1420_v18 = vpop.permute.xlu1 %1419 }
0x1c78   :  { %vm1421_vm13 = vcmp.eq.s32.totalorder %v1420_v18, 1 }
0x1cdb   :  { %v1405_v45 = vpop.permute.xlu0 %1404 }
0x1cdc   :  { %v1407_v46 = vadd.f32 %v1405_v45, %v165_v36 }
0x1cde   :  { %2570 = vtanh.f32 %v1407_v46 }
0x1ce8   :  { %v2571_v53 = vpop.eup %2570 }
0x1ce9   :  { %1411 = vrot.lane.b32.xlu0 %v2571_v53, %s2608_s4 }
0x1d5b   :  { %v1412_v26 = vpop.permute.xlu0 %1411 }
0x1d5c   :  { %v1414_v48 = vmul.f32 %v1412_v26, %v1409_v47 }
0x1d5e   :  { %v1416_v20 = vadd.f32 %v1415_v28, %v1414_v48 }
0x1d60   :  { %v1422_v49 = vsel %vm1421_vm13, %v1416_v20, %v1311_v25  ;;  %v3011_v57 = vsel %vm1421_vm13, %v1416_v20, 0.0 }
0x1d61   :  { %1425 = vrot.lane.b32.xlu1 %v1422_v49, %s2608_s4 }
0x1dd3   :  { %v1426_v58 = vpop.permute.xlu1 %1425 }
0x1dd4   :  { %v1428_v59 = vsel %vm105_vm1, %v1426_v58, 1.0 }
0x1dd5   :  { %2336 = vmatmul.mubr.msk.f32.vlgmr.msra.gmra.mrb[24].mxu0 %vm208_vm3, %v1428_v59 }
0x1dd6   :  { %2470 = vmatpush3.bf16.msra.mxu0 %v2914_v10  ;;  %2361 = vmatprep.mubr.msk.f32.mxu0 %vm2604_vm0, %v2605_v6 }
0x1dd7   :  { %2471 = vmatprep.subr.bf16.mxu0 %v2602_v0 }
0x1dda   :  { %2473 = vmatpush3.bf16.msra.mxu0 %v2920_v13 }
0x1ddb   :  { %2359 = vmatprep.subr.mxu0 %v2605_v6 }
0x1dde   :  { %2360 = vmatpush3.msk.msra.mxu0 %vm212_vm2, %v2933_v16 }
0x1ddf   :  { %2480 = vmatprep.subr.bf16.mxu0 %v2602_v0 }
0x1ea8   :  { %v1498_v61 = vpop.f32.mrb[24].mxu0 }
0x1ea9   :  { %1510 = vrot.lane.b32.xlu0 %v1498_v61, %s2607_s25  ;;  %v2337_v62 = vpop.f32.mrb[25].mxu0  ;;  %v1502_v1 = vadd.f32 %v1498_v61, %v169_v63  ;;  %v179_v61 = vadd.f32 %v2816_v52, %v2963_v38 }
0x1eab   :  { %v2073_v12 = vmul.f32 -1.442695, %v1502_v1 }
0x1ead   :  { %1530 = vperm.xlu0 %2495, %v1528_v7   ;;  %2572 = vpow2.f32 %v2073_v12 }
0x1eb7   :  { %v2573_v3 = vpop.eup %2572 }
0x1eb8   :  { %v1506_v4 = vadd.f32 1.0, %v2573_v3 }
0x1eba   :  { %2574 = vrcp.f32 %v1506_v4 }
0x1ec4   :  { %v2575_v5 = vpop.eup %2574 }
0x1ec5   :  { %v1520_v55 = vsub.f32 1.0, %v2575_v5  ;;  %v1526_v15 = vmul.f32 %v2575_v5, %v1422_v49 }
0x1f1b   :  { %v1511_v14 = vpop.permute.xlu0 %1510 }
0x1f1c   :  { %v1513_v17 = vmul.f32 %v2575_v5, %v1511_v14 }
0x1f1e   :  { %1515 = vrot.lane.b32.xlu1 %v1513_v17, %s2607_s25 }
0x1f2c   :  { %v1531_v21 = vpop.permute.xlu0 %1530 }
0x1f2d   :  { %vm1532_vm15 = vcmp.eq.s32.totalorder %v1531_v21, 1 }
0x1f90   :  { %v1516_v8 = vpop.permute.xlu1 %1515 }
0x1f91   :  { %v1518_v9 = vadd.f32 %v1516_v8, %v169_v63 }
0x1f93   :  { %2576 = vtanh.f32 %v1518_v9 }
0x1f9d   :  { %v2577_v29 = vpop.eup %2576 }
0x1f9e   :  { %1522 = vrot.lane.b32.xlu1 %v2577_v29, %s2608_s4 }
0x2010   :  { %v1523_v11 = vpop.permute.xlu1 %1522 }
0x2011   :  { %v1525_v51 = vmul.f32 %v1523_v11, %v1520_v55 }
0x2013   :  { %v1527_v23 = vadd.f32 %v1526_v15, %v1525_v51 }
0x2015   :  { %v1533_v19 = vsel %vm1532_vm15, %v1527_v23, %v1422_v49  ;;  %v3032_v22 = vsel %vm1532_vm15, %v1527_v23, 0.0  ;;  %v185_v23 = vadd.f32 %v2820_v54, %v2963_v38 }
0x2016   :  { %1536 = vrot.lane.b32.xlu0 %v1533_v19, %s2608_s4 }
0x2088   :  { %v1537_v24 = vpop.permute.xlu0 %1536 }
0x2089   :  { %v1539_v25 = vsel %vm105_vm1, %v1537_v24, 1.0 }
0x208a   :  { %2349 = vmatmul.mubr.msk.f32.vlgmr.msra.gmra.mrb[14].mxu1 %vm208_vm3, %v1539_v25 }
0x208b   :  { %2476 = vmatpush3.bf16.msra.mxu1 %v2914_v10  ;;  %2374 = vmatprep.mubr.msk.f32.mxu1 %vm2604_vm0, %v2605_v6 }
0x208c   :  { %2477 = vmatprep.subr.bf16.mxu1 %v2602_v0 }
0x208f   :  { %2479 = vmatpush3.bf16.msra.mxu1 %v2920_v13 }
0x2090   :  { %2372 = vmatprep.subr.mxu1 %v2605_v6 }
0x2093   :  { %2373 = vmatpush3.msk.msra.mxu1 %vm212_vm2, %v2933_v16 }
0x215d   :  { %v1609_v30 = vpop.f32.mrb[14].mxu1 }
0x215e   :  { %1621 = vrot.lane.b32.xlu1 %v1609_v30, %s2607_s25  ;;  %v2350_v31 = vpop.f32.mrb[15].mxu1  ;;  %v1613_v35 = vadd.f32 %v1609_v30, %v175_v34 }
0x2160   :  { %v2076_v36 = vmul.f32 -1.442695, %v1613_v35 }
0x2162   :  { %1641 = vperm.xlu1 %2494, %v1639_v32   ;;  %2578 = vpow2.f32 %v2076_v36 }
0x216c   :  { %v2579_v37 = vpop.eup %2578 }
0x216d   :  { %v1617_v39 = vadd.f32 1.0, %v2579_v37 }
0x216f   :  { %2580 = vrcp.f32 %v1617_v39 }
0x2179   :  { %v2581_v40 = vpop.eup %2580 }
0x217a   :  { %v1631_v46 = vsub.f32 1.0, %v2581_v40  ;;  %v1637_v47 = vmul.f32 %v2581_v40, %v1533_v19 }
0x21d0   :  { %v1622_v41 = vpop.permute.xlu1 %1621 }
0x21d1   :  { %v1624_v42 = vmul.f32 %v2581_v40, %v1622_v41 }
0x21d3   :  { %1626 = vrot.lane.b32.xlu0 %v1624_v42, %s2607_s25 }
0x21e1   :  { %v1642_v50 = vpop.permute.xlu1 %1641 }
0x21e2   :  { %vm1643_vm5 = vcmp.eq.s32.totalorder %v1642_v50, 1 }
0x2245   :  { %v1627_v43 = vpop.permute.xlu0 %1626 }
0x2246   :  { %v1629_v44 = vadd.f32 %v1627_v43, %v175_v34 }
0x2248   :  { %2582 = vtanh.f32 %v1629_v44 }
0x2252   :  { %v2583_v45 = vpop.eup %2582 }
0x2253   :  { %1633 = vrot.lane.b32.xlu0 %v2583_v45, %s2608_s4 }
0x22c5   :  { %v1634_v53 = vpop.permute.xlu0 %1633 }
0x22c6   :  { %v1636_v26 = vmul.f32 %v1634_v53, %v1631_v46 }
0x22c8   :  { %v1638_v18 = vadd.f32 %v1637_v47, %v1636_v26  ;;  %v1972_v26 = vsel %vm206_vm8, 1, %v2603_v2 }
0x22ca   :  { %v1644_v28 = vsel %vm1643_vm5, %v1638_v18, %v1533_v19  ;;  %v3052_v48 = vsel %vm1643_vm5, %v1638_v18, 0.0 }
0x22cb   :  { %1647 = vrot.lane.b32.xlu1 %v1644_v28, %s2608_s4 }
0x233d   :  { %v1648_v20 = vpop.permute.xlu1 %1647 }
0x233e   :  { %v1650_v49 = vsel %vm105_vm1, %v1648_v20, 1.0 }
0x233f   :  { %2362 = vmatmul.mubr.msk.f32.vlgmr.msra.gmra.mrb[26].mxu0 %vm208_vm3, %v1650_v49 }
0x2340   :  { %2482 = vmatpush3.bf16.msra.mxu0 %v2914_v10  ;;  %2387 = vmatprep.mubr.msk.f32.mxu0 %vm2604_vm0, %v2605_v6  ;;  %v1750_v10 = vsel %vm204_vm6, 1, %v2603_v2 }
0x2341   :  { %2483 = vmatprep.subr.bf16.mxu0 %v2602_v0 }
0x2344   :  { %2485 = vmatpush3.bf16.msra.mxu0 %v2920_v13 }
0x2345   :  { %2385 = vmatprep.subr.mxu0 %v2605_v6 }
0x2348   :  { %2386 = vmatpush3.msk.msra.mxu0 %vm212_vm2, %v2933_v16  ;;  %vm205_vm2 = vcmp.gt.s32.totalorder %v2956_v33, 6  ;;  %v189_v33 = vadd.f32 %v2824_v56, %v2963_v38 }
0x2349   :  { %v1861_v51 = vsel %vm205_vm2, 1, %v2603_v2 }
0x2412   :  { %v1720_v58 = vpop.f32.mrb[26].mxu0 }
0x2413   :  { %1732 = vrot.lane.b32.xlu0 %v1720_v58, %s2607_s25  ;;  %v2363_v59 = vpop.f32.mrb[27].mxu0  ;;  %v1724_v0 = vadd.f32 %v1720_v58, %v179_v61 }
0x2415   :  { %v2079_v62 = vmul.f32 -1.442695, %v1724_v0 }
0x2417   :  { %1752 = vperm.xlu0 %2495, %v1750_v10   ;;  %2584 = vpow2.f32 %v2079_v62 }
0x2421   :  { %v2585_v13 = vpop.eup %2584 }
0x2422   :  { %v1728_v6 = vadd.f32 1.0, %v2585_v13 }
0x2424   :  { %2586 = vrcp.f32 %v1728_v6 }
0x242e   :  { %v2587_v7 = vpop.eup %2586 }
0x242f   :  { %v1742_v4 = vsub.f32 1.0, %v2587_v7  ;;  %v1748_v14 = vmul.f32 %v2587_v7, %v1644_v28 }
0x2485   :  { %v1733_v16 = vpop.permute.xlu0 %1732 }
0x2486   :  { %v1735_v63 = vmul.f32 %v2587_v7, %v1733_v16 }
0x2488   :  { %1737 = vrot.lane.b32.xlu1 %v1735_v63, %s2607_s25 }
0x2496   :  { %v1753_v52 = vpop.permute.xlu0 %1752 }
0x2497   :  { %vm1754_vm0 = vcmp.eq.s32.totalorder %v1753_v52, 1 }
0x24fa   :  { %v1738_v1 = vpop.permute.xlu1 %1737 }
0x24fb   :  { %v1740_v12 = vadd.f32 %v1738_v1, %v179_v61 }
0x24fd   :  { %2588 = vtanh.f32 %v1740_v12 }
0x2507   :  { %v2589_v3 = vpop.eup %2588 }
0x2508   :  { %1744 = vrot.lane.b32.xlu1 %v2589_v3, %s2608_s4 }
0x257a   :  { %v1745_v5 = vpop.permute.xlu1 %1744 }
0x257b   :  { %v1747_v17 = vmul.f32 %v1745_v5, %v1742_v4 }
0x257d   :  { %v1749_v8 = vadd.f32 %v1748_v14, %v1747_v17 }
0x257f   :  { %v1755_v9 = vsel %vm1754_vm0, %v1749_v8, %v1644_v28  ;;  %v3072_v29 = vsel %vm1754_vm0, %v1749_v8, 0.0 }
0x2580   :  { %1758 = vrot.lane.b32.xlu0 %v1755_v9, %s2608_s4 }
0x25f2   :  { %v1759_v55 = vpop.permute.xlu0 %1758 }
0x25f3   :  { %v1761_v11 = vsel %vm105_vm1, %v1759_v55, 1.0 }
0x25f4   :  { %2375 = vmatmul.mubr.msk.f32.vlgmr.msra.gmra.mrb[16].mxu1 %vm208_vm3, %v1761_v11 }
0x26c7   :  { %v1831_v21 = vpop.f32.mrb[16].mxu1 }
0x26c8   :  { %1843 = vrot.lane.b32.xlu1 %v1831_v21, %s2607_s25  ;;  %v2376_v15 = vpop.f32.mrb[17].mxu1  ;;  %v1835_v19 = vadd.f32 %v1831_v21, %v185_v23 }
0x26ca   :  { %v2082_v24 = vmul.f32 -1.442695, %v1835_v19 }
0x26cc   :  { %1863 = vperm.xlu1 %2494, %v1861_v51   ;;  %2590 = vpow2.f32 %v2082_v24 }
0x26d6   :  { %v2591_v25 = vpop.eup %2590 }
0x26d7   :  { %v1839_v30 = vadd.f32 1.0, %v2591_v25 }
0x26d9   :  { %2592 = vrcp.f32 %v1839_v30 }
0x26e3   :  { %v2593_v31 = vpop.eup %2592 }
0x26e4   :  { %v1853_v39 = vsub.f32 1.0, %v2593_v31  ;;  %v1859_v41 = vmul.f32 %v2593_v31, %v1755_v9 }
0x273a   :  { %v1844_v32 = vpop.permute.xlu1 %1843 }
0x273b   :  { %v1846_v34 = vmul.f32 %v2593_v31, %v1844_v32 }
0x273d   :  { %1848 = vrot.lane.b32.xlu0 %v1846_v34, %s2607_s25 }
0x274b   :  { %v1864_v54 = vpop.permute.xlu1 %1863 }
0x274c   :  { %vm1865_vm7 = vcmp.eq.s32.totalorder %v1864_v54, 1 }
0x27af   :  { %v1849_v35 = vpop.permute.xlu0 %1848 }
0x27b0   :  { %v1851_v36 = vadd.f32 %v1849_v35, %v185_v23 }
0x27b2   :  { %2594 = vtanh.f32 %v1851_v36 }
0x27bc   :  { %v2595_v37 = vpop.eup %2594 }
0x27bd   :  { %1855 = vrot.lane.b32.xlu0 %v2595_v37, %s2608_s4 }
0x282f   :  { %v1856_v40 = vpop.permute.xlu0 %1855 }
0x2830   :  { %v1858_v42 = vmul.f32 %v1856_v40, %v1853_v39 }
0x2832   :  { %v1860_v43 = vadd.f32 %v1859_v41, %v1858_v42 }
0x2834   :  { %v1866_v44 = vsel %vm1865_vm7, %v1860_v43, %v1755_v9  ;;  %v1867_v45 = vsel %vm1865_vm7, %v1860_v43, 0.0 }
0x2835   :  { %1869 = vrot.lane.b32.xlu1 %v1866_v44, %s2608_s4 }
0x28a7   :  { %v1870_v46 = vpop.permute.xlu1 %1869 }
0x28a8   :  { %v1872_v53 = vsel %vm105_vm1, %v1870_v46, 1.0 }
0x28a9   :  { %2388 = vmatmul.mubr.msk.f32.vlgmr.msra.gmra.mrb[28].mxu0 %vm208_vm3, %v1872_v53  ;;  %vm2004_vm3 = vcmask 523264  }
0x297c   :  { %v1942_v50 = vpop.f32.mrb[28].mxu0 }
0x297d   :  { %1954 = vrot.lane.b32.xlu0 %v1942_v50, %s2607_s25  ;;  %v2389_v47 = vpop.f32.mrb[29].mxu0  ;;  %v1946_v18 = vadd.f32 %v1942_v50, %v189_v33 }
0x297f   :  { %v2085_v28 = vmul.f32 -1.442695, %v1946_v18 }
0x2981   :  { %1974 = vperm.xlu0 %2495, %v1972_v26   ;;  %2596 = vpow2.f32 %v2085_v28 }
0x2985   :  { %1980 = vrot.lane.b32.xlu0 %v2969_v60, %s2608_s4 }
0x2989   :  { %1984 = vrot.lane.b32.xlu0 %v3011_v57, %s2609_s2 }
0x298b   :  { %v2597_v20 = vpop.eup %2596 }
0x298c   :  { %v1950_v49 = vadd.f32 1.0, %v2597_v20 }
0x298d   :  { %1988 = vrot.lane.b32.xlu0 %v3032_v22, %s2607_s25 }
0x298e   :  { %2598 = vrcp.f32 %v1950_v49 }
0x2998   :  { %v2599_v2 = vpop.eup %2598 }
0x2999   :  { %v1970_v7 = vmul.f32 %v2599_v2, %v1866_v44 }
0x29ef   :  { %v1955_v58 = vpop.permute.xlu0 %1954 }
0x29f0   :  { %v1957_v59 = vmul.f32 %v2599_v2, %v1955_v58 }
0x29f2   :  { %1959 = vrot.lane.b32.xlu1 %v1957_v59, %s2607_s25 }
0x2a00   :  { %v1975_v60 = vpop.permute.xlu0 %1974 }
0x2a01   :  { %vm1976_vm10 = vcmp.eq.s32.totalorder %v1975_v60, 1 }
0x2a04   :  { %v1981_v10 = vpop.permute.xlu0 %1980 }
0x2a05   :  { %v2003_v22 = vsel %vm105_vm1, %v1981_v10, %v2990_v27  ;;  %v1964_v27 = vsub.f32 1.0, %v2599_v2 }
0x2a08   :  { %v1985_v57 = vpop.permute.xlu0 %1984 }
0x2a09   :  { %v2005_v56 = vsel %vm2004_vm3, %v2003_v22, %v1985_v57 }
0x2a0c   :  { %v1989_v38 = vpop.permute.xlu0 %1988 }
0x2a0d   :  { %v2007_v61 = vsel %vm2006_vm9, %v2005_v56, %v1989_v38 }
0x2a0e   :  { %2011 = vst [vmem:[%s3130_s7] sm:$0xff] %v2007_v61 }
0x2a64   :  { %v1960_v0 = vpop.permute.xlu1 %1959 }
0x2a65   :  { %v1962_v62 = vadd.f32 %v1960_v0, %v189_v33 }
0x2a67   :  { %2600 = vtanh.f32 %v1962_v62 }
0x2a71   :  { %v2601_v13 = vpop.eup %2600 }
0x2a72   :  { %1966 = vrot.lane.b32.xlu1 %v2601_v13, %s2608_s4 }
0x2a76   :  { %1992 = vrot.lane.b32.xlu1 %v3052_v48, %s2608_s4 }
0x2a7a   :  { %1996 = vrot.lane.b32.xlu1 %v1867_v45, %s2609_s2 }
0x2ae4   :  { %v1967_v6 = vpop.permute.xlu1 %1966 }
0x2ae5   :  { %v1969_v16 = vmul.f32 %v1967_v6, %v1964_v27 }
0x2ae7   :  { %v1971_v63 = vadd.f32 %v1970_v7, %v1969_v16 }
0x2ae8   :  { %v1993_v3 = vpop.permute.xlu1 %1992 }
0x2ae9   :  { %v1978_v1 = vsel %vm1976_vm10, %v1971_v63, 0.0  ;;  %v1977_v12 = vsel %vm1976_vm10, %v1971_v63, %v1866_v44  ;;  %v2008_v5 = vsel %vm105_vm1, %v1993_v3, %v3072_v29 }
0x2aea   :  { %2000 = vrot.lane.b32.xlu1 %v1978_v1, %s2607_s25  ;;  %2014 = vrot.lane.b32.xlu0 %v1977_v12, %s2608_s4 }
0x2aec   :  { %v1997_v4 = vpop.permute.xlu1 %1996 }
0x2aed   :  { %v2009_v48 = vsel %vm2004_vm3, %v2008_v5, %v1997_v4 }
0x2b5c   :  { %v2015_v52 = vpop.permute.xlu0 %2014  ;;  %v2001_v14 = vpop.permute.xlu1 %2000 }
0x2b5d   :  { %2017 = vst.msk [vmem:[%s3131_s8] sm:$0xff] %vm105_vm1, %v2015_v52  ;;  %v2010_v17 = vsel %vm2006_vm9, %v2009_v48, %v2001_v14 }
0x2b5e   :  { %2012 = vst [vmem:[%s3130_s7 + $0x8] sm:$0xff] %v2010_v17 }

</bundles_post_ra>
